<compile_context>
chip_gen: v6e
topology: v6e:2x2x1
jax: 0.10.0
libtpu: 0.0.40
codegen_flags: <defaults>
</compile_context>

<pallas_src>
import functools

import jax
import jax.numpy as jnp
from jax import lax
from jax.experimental import pallas as pl
from jax.experimental.pallas import tpu as pltpu

SEQ = 160            # fixed by the module: x.view(160, -1, num_channel)
NUM_LAYERS = 2       # lstm_num default


def _sigmoid(z):
    # exp + divide lower to EUP/VPU; used identically in kernel and reference.
    return 1.0 / (1.0 + jnp.exp(-z))


def _lstm2_kernel(x_ref, wih0_ref, whh0_ref, b0_ref,
                  wih1_ref, whh1_ref, b1_ref, h0_ref, c0_ref,
                  out_ref, hn_ref, cn_ref, y0_ref, *, seq, hidden):
    """Fused 2-layer LSTM over the full sequence (single program, all in VMEM).

    x_ref   : (S, B, C)      time-major input
    wih*    : (Cin, 4H)      input->gates weights (pre-transposed in wrapper)
    whh*    : (H, 4H)        hidden->gates weights (pre-transposed in wrapper)
    b*      : (1, 4H)        folded bias (b_ih + b_hh)
    h0/c0   : (2, B, H)      initial per-layer state
    out_ref : (S, B, H)      layer-1 hidden sequence (row-major == torch .view order)
    hn/cn   : (2, B, H)      final per-layer state
    y0_ref  : (S, B, H)      VMEM scratch: layer-0 hidden sequence
    """
    H = hidden

    def run_layer(in_ref, wih, whh, bias, h_init, c_init, o_ref):
        def step(t, carry):
            h, c = carry
            gates = (jnp.dot(in_ref[t], wih, preferred_element_type=jnp.float32)
                     + jnp.dot(h, whh, preferred_element_type=jnp.float32)
                     + bias)                                  # (B, 4H), gates on lanes
            i = _sigmoid(gates[:, 0:H])
            f = _sigmoid(gates[:, H:2 * H])
            g = jnp.tanh(gates[:, 2 * H:3 * H])
            o = _sigmoid(gates[:, 3 * H:4 * H])
            c = f * c + i * g
            h = o * jnp.tanh(c)
            o_ref[t] = h                                      # leading-dim dynamic store
            return (h, c)
        return lax.fori_loop(0, seq, step, (h_init, c_init))

    # layer 0: C -> H
    h, c = run_layer(x_ref, wih0_ref[...], whh0_ref[...], b0_ref[...],
                     h0_ref[0], c0_ref[0], y0_ref)
    hn_ref[0] = h
    cn_ref[0] = c

    # TODO(synk): nn.LSTM inter-layer dropout is a train-mode op; eval forward has none.

    # layer 1: H -> H (input is the layer-0 sequence kept in VMEM scratch)
    h, c = run_layer(y0_ref, wih1_ref[...], whh1_ref[...], b1_ref[...],
                     h0_ref[1], c0_ref[1], out_ref)
    hn_ref[1] = h
    cn_ref[1] = c


def lstm2_forward(x3, params, h0, c0):
    """x3: (S, B, C) time-major input. Returns (out (S,B,H), h_n (2,B,H), c_n (2,B,H))."""
    s, b, c_in = x3.shape
    h_dim = 2 * c_in

    def prep(layer):
        wih = jnp.transpose(params[f'w_ih_l{layer}'])                 # (4H, In) -> (In, 4H)
        whh = jnp.transpose(params[f'w_hh_l{layer}'])                 # (4H, H)  -> (H, 4H)
        bias = (params[f'b_ih_l{layer}'] + params[f'b_hh_l{layer}']).reshape(1, 4 * h_dim)
        return wih, whh, bias

    wih0, whh0, b0 = prep(0)
    wih1, whh1, b1 = prep(1)

    kernel = functools.partial(_lstm2_kernel, seq=s, hidden=h_dim)
    out, hn, cn = pl.pallas_call(
        kernel,
        out_shape=(jax.ShapeDtypeStruct((s, b, h_dim), jnp.float32),
                   jax.ShapeDtypeStruct((NUM_LAYERS, b, h_dim), jnp.float32),
                   jax.ShapeDtypeStruct((NUM_LAYERS, b, h_dim), jnp.float32)),
        scratch_shapes=[pltpu.VMEM((s, b, h_dim), jnp.float32)],
    )(x3, wih0, whh0, b0, wih1, whh1, b1, h0, c0)
    return out, hn, cn


def _linear_kernel(x_ref, w_ref, b_ref, o_ref):
    o_ref[...] = (jnp.dot(x_ref[...], w_ref[...], preferred_element_type=jnp.float32)
                  + b_ref[...])


def linear_forward(x2, w, bias):
    """x2: (B, F_in); w: (F_out, F_in) torch layout; bias: (F_out,)."""
    n = x2.shape[0]
    f_out = w.shape[0]
    return pl.pallas_call(
        _linear_kernel,
        out_shape=jax.ShapeDtypeStruct((n, f_out), jnp.float32),
    )(x2, jnp.transpose(w), bias.reshape(1, f_out))


def model_forward(x, params, hidden=None):
    """Matches LSTM.forward: returns (linear(lstm_out.view(-1, 2C*160)), (h_n, c_n))."""
    c_in = params['w_ih_l0'].shape[1]
    h_dim = 2 * c_in
    x3 = jnp.reshape(x, (SEQ, -1, c_in))            # x.view(160, -1, num_channel)
    b = x3.shape[1]
    if hidden is None:
        h0 = jnp.zeros((NUM_LAYERS, b, h_dim), jnp.float32)
        c0 = jnp.zeros((NUM_LAYERS, b, h_dim), jnp.float32)
    else:
        h0, c0 = hidden
    out, hn, cn = lstm2_forward(x3, params, h0, c0)
    xf = jnp.reshape(out, (-1, h_dim * SEQ))        # x.view(-1, 2C*160): free row-major reshape
    y = linear_forward(xf, params['linear_w'], params['linear_b'])
    return y, (hn, cn)


def init_params(key, num_channel):
    """Deterministic params mirroring nn.LSTM / nn.Linear shapes (PyTorch layouts)."""
    c_in = num_channel
    h_dim = 2 * c_in
    bound = 1.0 / (h_dim ** 0.5)
    keys = jax.random.split(key, 4)
    p = {}
    in_sizes = [c_in, h_dim]
    for layer in range(NUM_LAYERS):
        k0, k1, k2, k3 = jax.random.split(keys[layer], 4)
        p[f'w_ih_l{layer}'] = jax.random.uniform(k0, (4 * h_dim, in_sizes[layer]),
                                                 jnp.float32, -bound, bound)
        p[f'w_hh_l{layer}'] = jax.random.uniform(k1, (4 * h_dim, h_dim),
                                                 jnp.float32, -bound, bound)
        p[f'b_ih_l{layer}'] = jax.random.uniform(k2, (4 * h_dim,), jnp.float32, -bound, bound)
        p[f'b_hh_l{layer}'] = jax.random.uniform(k3, (4 * h_dim,), jnp.float32, -bound, bound)
    f_in = h_dim * SEQ
    lb = 1.0 / (f_in ** 0.5)
    # nn.Linear default init (the module's .initialize() normal_ override is a separate
    # method and is not part of forward()).
    p['linear_w'] = jax.random.uniform(keys[2], (512, f_in), jnp.float32, -lb, lb)
    p['linear_b'] = jax.random.uniform(keys[3], (512,), jnp.float32, -lb, lb)
    return p


def reference_forward(x, params, hidden=None):
    """Pure-JAX reference (lax.scan LSTM) for correctness checking only."""
    c_in = params['w_ih_l0'].shape[1]
    h_dim = 2 * c_in
    x3 = jnp.reshape(x, (SEQ, -1, c_in))
    b = x3.shape[1]
    if hidden is None:
        h0 = jnp.zeros((NUM_LAYERS, b, h_dim), jnp.float32)
        c0 = jnp.zeros((NUM_LAYERS, b, h_dim), jnp.float32)
    else:
        h0, c0 = hidden

    def run_layer(inp, layer, h, c):
        wih, whh = params[f'w_ih_l{layer}'], params[f'w_hh_l{layer}']
        bias = params[f'b_ih_l{layer}'] + params[f'b_hh_l{layer}']

        def step(carry, x_t):
            h, c = carry
            gates = x_t @ wih.T + h @ whh.T + bias
            i, f, g, o = jnp.split(gates, 4, axis=-1)
            c = _sigmoid(f) * c + _sigmoid(i) * jnp.tanh(g)
            h = _sigmoid(o) * jnp.tanh(c)
            return (h, c), h

        (h, c), ys = lax.scan(step, (h, c), inp)
        return ys, h, c

    y0, h0n, c0n = run_layer(x3, 0, h0[0], c0[0])
    y1, h1n, c1n = run_layer(y0, 1, h0[1], c0[1])
    xf = jnp.reshape(y1, (-1, h_dim * SEQ))
    y = xf @ params['linear_w'].T + params['linear_b']
    return y, (jnp.stack([h0n, h1n]), jnp.stack([c0n, c1n]))


if __name__ == "__main__":
    key = jax.random.PRNGKey(0)
    kx, kp = jax.random.split(key)

    num_channel = 4                      # C; hidden = 2C = 8
    batch = 2
    # Module reshapes its input via x.view(160, -1, C); build x already in that layout.
    x = jax.random.normal(kx, (SEQ, batch, num_channel), jnp.float32)
    params = init_params(kp, num_channel)

    fwd = jax.jit(model_forward)
    y, (hn, cn) = jax.block_until_ready(fwd(x, params))

    assert y.shape == (batch, 512), y.shape
    assert hn.shape == (NUM_LAYERS, batch, 2 * num_channel), hn.shape
    assert cn.shape == (NUM_LAYERS, batch, 2 * num_channel), cn.shape

    y_r, (hn_r, cn_r) = reference_forward(x, params)
    err = max(float(jnp.max(jnp.abs(y - y_r))),
              float(jnp.max(jnp.abs(hn - hn_r))),
              float(jnp.max(jnp.abs(cn - cn_r))))
    assert err < 2e-2, f"max abs err {err}"

    print("KERNEL_OK")
</pallas_src>

<mosaic_0001>
module attributes {stable_mosaic.version = 11 : i64} {
  func.func @_lstm2_kernel(%arg0: memref<160x2x4xf32, #tpu.memory_space<vmem>>, %arg1: memref<4x32xf32, #tpu.memory_space<vmem>>, %arg2: memref<8x32xf32, #tpu.memory_space<vmem>>, %arg3: memref<1x32xf32, #tpu.memory_space<vmem>>, %arg4: memref<8x32xf32, #tpu.memory_space<vmem>>, %arg5: memref<8x32xf32, #tpu.memory_space<vmem>>, %arg6: memref<1x32xf32, #tpu.memory_space<vmem>>, %arg7: memref<2x2x8xf32, #tpu.memory_space<vmem>>, %arg8: memref<2x2x8xf32, #tpu.memory_space<vmem>>, %arg9: memref<160x2x8xf32, #tpu.memory_space<vmem>>, %arg10: memref<2x2x8xf32, #tpu.memory_space<vmem>>, %arg11: memref<2x2x8xf32, #tpu.memory_space<vmem>>, %arg12: memref<160x2x8xf32, #tpu.memory_space<vmem>>) attributes {dimension_semantics = [], scalar_prefetch = 0 : i64, scratch_operands = 1 : i64, tpu.core_type = #tpu.core_type<tc>} {
    %c0 = arith.constant 0 : index
    %c0_0 = arith.constant 0 : index
    %0 = vector.load %arg1[%c0, %c0_0] : memref<4x32xf32, #tpu.memory_space<vmem>>, vector<4x32xf32>
    %c0_1 = arith.constant 0 : index
    %c0_2 = arith.constant 0 : index
    %1 = vector.load %arg2[%c0_1, %c0_2] : memref<8x32xf32, #tpu.memory_space<vmem>>, vector<8x32xf32>
    %c0_3 = arith.constant 0 : index
    %c0_4 = arith.constant 0 : index
    %2 = vector.load %arg3[%c0_3, %c0_4] : memref<1x32xf32, #tpu.memory_space<vmem>>, vector<1x32xf32>
    %c0_5 = arith.constant 0 : index
    %c0_6 = arith.constant 0 : index
    %c0_7 = arith.constant 0 : index
    %3 = vector.load %arg7[%c0_5, %c0_6, %c0_7] : memref<2x2x8xf32, #tpu.memory_space<vmem>>, vector<1x2x8xf32>
    %4 = vector.shape_cast %3 : vector<1x2x8xf32> to vector<2x8xf32>
    %c0_8 = arith.constant 0 : index
    %c0_9 = arith.constant 0 : index
    %c0_10 = arith.constant 0 : index
    %5 = vector.load %arg8[%c0_8, %c0_9, %c0_10] : memref<2x2x8xf32, #tpu.memory_space<vmem>>, vector<1x2x8xf32>
    %6 = vector.shape_cast %5 : vector<1x2x8xf32> to vector<2x8xf32>
    %c0_i32 = arith.constant 0 : i32
    %c160_i32 = arith.constant 160 : i32
    %7 = arith.addi %c0_i32, %c160_i32 : i32
    %c1_i32 = arith.constant 1 : i32
    %8:2 = scf.for %arg13 = %c0_i32 to %7 step %c1_i32 iter_args(%arg14 = %4, %arg15 = %6) -> (vector<2x8xf32>, vector<2x8xf32>)  : i32 {
      %30 = arith.index_cast %arg13 : i32 to index
      %c0_39 = arith.constant 0 : index
      %c0_40 = arith.constant 0 : index
      %31 = vector.load %arg0[%30, %c0_39, %c0_40] : memref<160x2x4xf32, #tpu.memory_space<vmem>>, vector<1x2x4xf32>
      %32 = vector.shape_cast %31 : vector<1x2x4xf32> to vector<2x4xf32>
      %cst = arith.constant dense<0.000000e+00> : vector<2x32xf32>
      %33 = tpu.matmul %32, %0, %cst {dimension_numbers = #tpu.dot_dimension_numbers<[1], [0], [0], [1], [0, 0, 1, 1], [], []>} : vector<2x4xf32>, vector<4x32xf32>, vector<2x32xf32> -> vector<2x32xf32>
      %cst_41 = arith.constant dense<0.000000e+00> : vector<2x32xf32>
      %34 = tpu.matmul %arg14, %1, %cst_41 {dimension_numbers = #tpu.dot_dimension_numbers<[1], [0], [0], [1], [0, 0, 1, 1], [], []>} : vector<2x8xf32>, vector<8x32xf32>, vector<2x32xf32> -> vector<2x32xf32>
      %35 = arith.addf %33, %34 : vector<2x32xf32>
      %36 = vector.broadcast %2 : vector<1x32xf32> to vector<2x32xf32>
      %37 = arith.addf %35, %36 : vector<2x32xf32>
      %38 = vector.extract_strided_slice %37 {offsets = [0, 0], sizes = [2, 8], strides = [1, 1]} : vector<2x32xf32> to vector<2x8xf32>
      %cst_42 = arith.constant 0.000000e+00 : f32
      %39 = vector.broadcast %cst_42 : f32 to vector<2x8xf32>
      %40 = arith.subf %39, %38 : vector<2x8xf32>
      %41 = math.exp %40 : vector<2x8xf32>
      %cst_43 = arith.constant 1.000000e+00 : f32
      %42 = vector.broadcast %cst_43 : f32 to vector<2x8xf32>
      %43 = arith.addf %42, %41 : vector<2x8xf32>
      %cst_44 = arith.constant 1.000000e+00 : f32
      %44 = vector.broadcast %cst_44 : f32 to vector<2x8xf32>
      %45 = arith.divf %44, %43 : vector<2x8xf32>
      %46 = vector.extract_strided_slice %37 {offsets = [0, 8], sizes = [2, 8], strides = [1, 1]} : vector<2x32xf32> to vector<2x8xf32>
      %cst_45 = arith.constant 0.000000e+00 : f32
      %47 = vector.broadcast %cst_45 : f32 to vector<2x8xf32>
      %48 = arith.subf %47, %46 : vector<2x8xf32>
      %49 = math.exp %48 : vector<2x8xf32>
      %cst_46 = arith.constant 1.000000e+00 : f32
      %50 = vector.broadcast %cst_46 : f32 to vector<2x8xf32>
      %51 = arith.addf %50, %49 : vector<2x8xf32>
      %cst_47 = arith.constant 1.000000e+00 : f32
      %52 = vector.broadcast %cst_47 : f32 to vector<2x8xf32>
      %53 = arith.divf %52, %51 : vector<2x8xf32>
      %54 = vector.extract_strided_slice %37 {offsets = [0, 16], sizes = [2, 8], strides = [1, 1]} : vector<2x32xf32> to vector<2x8xf32>
      %55 = math.tanh %54 : vector<2x8xf32>
      %56 = vector.extract_strided_slice %37 {offsets = [0, 24], sizes = [2, 8], strides = [1, 1]} : vector<2x32xf32> to vector<2x8xf32>
      %cst_48 = arith.constant 0.000000e+00 : f32
      %57 = vector.broadcast %cst_48 : f32 to vector<2x8xf32>
      %58 = arith.subf %57, %56 : vector<2x8xf32>
      %59 = math.exp %58 : vector<2x8xf32>
      %cst_49 = arith.constant 1.000000e+00 : f32
      %60 = vector.broadcast %cst_49 : f32 to vector<2x8xf32>
      %61 = arith.addf %60, %59 : vector<2x8xf32>
      %cst_50 = arith.constant 1.000000e+00 : f32
      %62 = vector.broadcast %cst_50 : f32 to vector<2x8xf32>
      %63 = arith.divf %62, %61 : vector<2x8xf32>
      %64 = arith.mulf %53, %arg15 : vector<2x8xf32>
      %65 = arith.mulf %45, %55 : vector<2x8xf32>
      %66 = arith.addf %64, %65 : vector<2x8xf32>
      %67 = math.tanh %66 : vector<2x8xf32>
      %68 = arith.mulf %63, %67 : vector<2x8xf32>
      %69 = arith.index_cast %arg13 : i32 to index
      %c0_51 = arith.constant 0 : index
      %c0_52 = arith.constant 0 : index
      %70 = vector.load %arg12[%69, %c0_51, %c0_52] : memref<160x2x8xf32, #tpu.memory_space<vmem>>, vector<1x2x8xf32>
      %71 = vector.shape_cast %70 : vector<1x2x8xf32> to vector<2x8xf32>
      %72 = vector.shape_cast %68 : vector<2x8xf32> to vector<1x2x8xf32>
      tpu.vector_store %arg12[%69, %c0_51, %c0_52], %72 {strides = array<i32>} : memref<160x2x8xf32, #tpu.memory_space<vmem>>, vector<1x2x8xf32>,
      scf.yield %68, %66 : vector<2x8xf32>, vector<2x8xf32>
    }
    %c160_i32_11 = arith.constant 160 : i32
    %c0_12 = arith.constant 0 : index
    %c0_13 = arith.constant 0 : index
    %c0_14 = arith.constant 0 : index
    %9 = vector.load %arg10[%c0_12, %c0_13, %c0_14] : memref<2x2x8xf32, #tpu.memory_space<vmem>>, vector<1x2x8xf32>
    %10 = vector.shape_cast %9 : vector<1x2x8xf32> to vector<2x8xf32>
    %11 = vector.shape_cast %8#0 : vector<2x8xf32> to vector<1x2x8xf32>
    tpu.vector_store %arg10[%c0_12, %c0_13, %c0_14], %11 {strides = array<i32>} : memref<2x2x8xf32, #tpu.memory_space<vmem>>, vector<1x2x8xf32>,
    %c0_15 = arith.constant 0 : index
    %c0_16 = arith.constant 0 : index
    %c0_17 = arith.constant 0 : index
    %12 = vector.load %arg11[%c0_15, %c0_16, %c0_17] : memref<2x2x8xf32, #tpu.memory_space<vmem>>, vector<1x2x8xf32>
    %13 = vector.shape_cast %12 : vector<1x2x8xf32> to vector<2x8xf32>
    %14 = vector.shape_cast %8#1 : vector<2x8xf32> to vector<1x2x8xf32>
    tpu.vector_store %arg11[%c0_15, %c0_16, %c0_17], %14 {strides = array<i32>} : memref<2x2x8xf32, #tpu.memory_space<vmem>>, vector<1x2x8xf32>,
    %c0_18 = arith.constant 0 : index
    %c0_19 = arith.constant 0 : index
    %15 = vector.load %arg4[%c0_18, %c0_19] : memref<8x32xf32, #tpu.memory_space<vmem>>, vector<8x32xf32>
    %c0_20 = arith.constant 0 : index
    %c0_21 = arith.constant 0 : index
    %16 = vector.load %arg5[%c0_20, %c0_21] : memref<8x32xf32, #tpu.memory_space<vmem>>, vector<8x32xf32>
    %c0_22 = arith.constant 0 : index
    %c0_23 = arith.constant 0 : index
    %17 = vector.load %arg6[%c0_22, %c0_23] : memref<1x32xf32, #tpu.memory_space<vmem>>, vector<1x32xf32>
    %c1 = arith.constant 1 : index
    %c0_24 = arith.constant 0 : index
    %c0_25 = arith.constant 0 : index
    %18 = vector.load %arg7[%c1, %c0_24, %c0_25] : memref<2x2x8xf32, #tpu.memory_space<vmem>>, vector<1x2x8xf32>
    %19 = vector.shape_cast %18 : vector<1x2x8xf32> to vector<2x8xf32>
    %c1_26 = arith.constant 1 : index
    %c0_27 = arith.constant 0 : index
    %c0_28 = arith.constant 0 : index
    %20 = vector.load %arg8[%c1_26, %c0_27, %c0_28] : memref<2x2x8xf32, #tpu.memory_space<vmem>>, vector<1x2x8xf32>
    %21 = vector.shape_cast %20 : vector<1x2x8xf32> to vector<2x8xf32>
    %c0_i32_29 = arith.constant 0 : i32
    %c160_i32_30 = arith.constant 160 : i32
    %22 = arith.addi %c0_i32_29, %c160_i32_30 : i32
    %c1_i32_31 = arith.constant 1 : i32
    %23:2 = scf.for %arg13 = %c0_i32_29 to %22 step %c1_i32_31 iter_args(%arg14 = %19, %arg15 = %21) -> (vector<2x8xf32>, vector<2x8xf32>)  : i32 {
      %30 = arith.index_cast %arg13 : i32 to index
      %c0_39 = arith.constant 0 : index
      %c0_40 = arith.constant 0 : index
      %31 = vector.load %arg12[%30, %c0_39, %c0_40] : memref<160x2x8xf32, #tpu.memory_space<vmem>>, vector<1x2x8xf32>
      %32 = vector.shape_cast %31 : vector<1x2x8xf32> to vector<2x8xf32>
      %cst = arith.constant dense<0.000000e+00> : vector<2x32xf32>
      %33 = tpu.matmul %32, %15, %cst {dimension_numbers = #tpu.dot_dimension_numbers<[1], [0], [0], [1], [0, 0, 1, 1], [], []>} : vector<2x8xf32>, vector<8x32xf32>, vector<2x32xf32> -> vector<2x32xf32>
      %cst_41 = arith.constant dense<0.000000e+00> : vector<2x32xf32>
      %34 = tpu.matmul %arg14, %16, %cst_41 {dimension_numbers = #tpu.dot_dimension_numbers<[1], [0], [0], [1], [0, 0, 1, 1], [], []>} : vector<2x8xf32>, vector<8x32xf32>, vector<2x32xf32> -> vector<2x32xf32>
      %35 = arith.addf %33, %34 : vector<2x32xf32>
      %36 = vector.broadcast %17 : vector<1x32xf32> to vector<2x32xf32>
      %37 = arith.addf %35, %36 : vector<2x32xf32>
      %38 = vector.extract_strided_slice %37 {offsets = [0, 0], sizes = [2, 8], strides = [1, 1]} : vector<2x32xf32> to vector<2x8xf32>
      %cst_42 = arith.constant 0.000000e+00 : f32
      %39 = vector.broadcast %cst_42 : f32 to vector<2x8xf32>
      %40 = arith.subf %39, %38 : vector<2x8xf32>
      %41 = math.exp %40 : vector<2x8xf32>
      %cst_43 = arith.constant 1.000000e+00 : f32
      %42 = vector.broadcast %cst_43 : f32 to vector<2x8xf32>
      %43 = arith.addf %42, %41 : vector<2x8xf32>
      %cst_44 = arith.constant 1.000000e+00 : f32
      %44 = vector.broadcast %cst_44 : f32 to vector<2x8xf32>
      %45 = arith.divf %44, %43 : vector<2x8xf32>
      %46 = vector.extract_strided_slice %37 {offsets = [0, 8], sizes = [2, 8], strides = [1, 1]} : vector<2x32xf32> to vector<2x8xf32>
      %cst_45 = arith.constant 0.000000e+00 : f32
      %47 = vector.broadcast %cst_45 : f32 to vector<2x8xf32>
      %48 = arith.subf %47, %46 : vector<2x8xf32>
      %49 = math.exp %48 : vector<2x8xf32>
      %cst_46 = arith.constant 1.000000e+00 : f32
      %50 = vector.broadcast %cst_46 : f32 to vector<2x8xf32>
      %51 = arith.addf %50, %49 : vector<2x8xf32>
      %cst_47 = arith.constant 1.000000e+00 : f32
      %52 = vector.broadcast %cst_47 : f32 to vector<2x8xf32>
      %53 = arith.divf %52, %51 : vector<2x8xf32>
      %54 = vector.extract_strided_slice %37 {offsets = [0, 16], sizes = [2, 8], strides = [1, 1]} : vector<2x32xf32> to vector<2x8xf32>
      %55 = math.tanh %54 : vector<2x8xf32>
      %56 = vector.extract_strided_slice %37 {offsets = [0, 24], sizes = [2, 8], strides = [1, 1]} : vector<2x32xf32> to vector<2x8xf32>
      %cst_48 = arith.constant 0.000000e+00 : f32
      %57 = vector.broadcast %cst_48 : f32 to vector<2x8xf32>
      %58 = arith.subf %57, %56 : vector<2x8xf32>
      %59 = math.exp %58 : vector<2x8xf32>
      %cst_49 = arith.constant 1.000000e+00 : f32
      %60 = vector.broadcast %cst_49 : f32 to vector<2x8xf32>
      %61 = arith.addf %60, %59 : vector<2x8xf32>
      %cst_50 = arith.constant 1.000000e+00 : f32
      %62 = vector.broadcast %cst_50 : f32 to vector<2x8xf32>
      %63 = arith.divf %62, %61 : vector<2x8xf32>
      %64 = arith.mulf %53, %arg15 : vector<2x8xf32>
      %65 = arith.mulf %45, %55 : vector<2x8xf32>
      %66 = arith.addf %64, %65 : vector<2x8xf32>
      %67 = math.tanh %66 : vector<2x8xf32>
      %68 = arith.mulf %63, %67 : vector<2x8xf32>
      %69 = arith.index_cast %arg13 : i32 to index
      %c0_51 = arith.constant 0 : index
      %c0_52 = arith.constant 0 : index
      %70 = vector.load %arg9[%69, %c0_51, %c0_52] : memref<160x2x8xf32, #tpu.memory_space<vmem>>, vector<1x2x8xf32>
      %71 = vector.shape_cast %70 : vector<1x2x8xf32> to vector<2x8xf32>
      %72 = vector.shape_cast %68 : vector<2x8xf32> to vector<1x2x8xf32>
      tpu.vector_store %arg9[%69, %c0_51, %c0_52], %72 {strides = array<i32>} : memref<160x2x8xf32, #tpu.memory_space<vmem>>, vector<1x2x8xf32>,
      scf.yield %68, %66 : vector<2x8xf32>, vector<2x8xf32>
    }
    %c160_i32_32 = arith.constant 160 : i32
    %c1_33 = arith.constant 1 : index
    %c0_34 = arith.constant 0 : index
    %c0_35 = arith.constant 0 : index
    %24 = vector.load %arg10[%c1_33, %c0_34, %c0_35] : memref<2x2x8xf32, #tpu.memory_space<vmem>>, vector<1x2x8xf32>
    %25 = vector.shape_cast %24 : vector<1x2x8xf32> to vector<2x8xf32>
    %26 = vector.shape_cast %23#0 : vector<2x8xf32> to vector<1x2x8xf32>
    tpu.vector_store %arg10[%c1_33, %c0_34, %c0_35], %26 {strides = array<i32>} : memref<2x2x8xf32, #tpu.memory_space<vmem>>, vector<1x2x8xf32>,
    %c1_36 = arith.constant 1 : index
    %c0_37 = arith.constant 0 : index
    %c0_38 = arith.constant 0 : index
    %27 = vector.load %arg11[%c1_36, %c0_37, %c0_38] : memref<2x2x8xf32, #tpu.memory_space<vmem>>, vector<1x2x8xf32>
    %28 = vector.shape_cast %27 : vector<1x2x8xf32> to vector<2x8xf32>
    %29 = vector.shape_cast %23#1 : vector<2x8xf32> to vector<1x2x8xf32>
    tpu.vector_store %arg11[%c1_36, %c0_37, %c0_38], %29 {strides = array<i32>} : memref<2x2x8xf32, #tpu.memory_space<vmem>>, vector<1x2x8xf32>,
    return
  }
}

module attributes {stable_mosaic.version = 11 : i64} {
  func.func @_linear_kernel(%arg0: memref<2x1280xf32, #tpu.memory_space<vmem>>, %arg1: memref<1280x512xf32, #tpu.memory_space<vmem>>, %arg2: memref<1x512xf32, #tpu.memory_space<vmem>>, %arg3: memref<2x512xf32, #tpu.memory_space<vmem>>) attributes {dimension_semantics = [], scalar_prefetch = 0 : i64, scratch_operands = 0 : i64, tpu.core_type = #tpu.core_type<tc>} {
    %c0 = arith.constant 0 : index
    %c0_0 = arith.constant 0 : index
    %0 = vector.load %arg0[%c0, %c0_0] : memref<2x1280xf32, #tpu.memory_space<vmem>>, vector<2x1280xf32>
    %c0_1 = arith.constant 0 : index
    %c0_2 = arith.constant 0 : index
    %1 = vector.load %arg1[%c0_1, %c0_2] : memref<1280x512xf32, #tpu.memory_space<vmem>>, vector<1280x512xf32>
    %cst = arith.constant dense<0.000000e+00> : vector<2x512xf32>
    %2 = tpu.matmul %0, %1, %cst {dimension_numbers = #tpu.dot_dimension_numbers<[1], [0], [0], [1], [0, 0, 1, 1], [], []>} : vector<2x1280xf32>, vector<1280x512xf32>, vector<2x512xf32> -> vector<2x512xf32>
    %c0_3 = arith.constant 0 : index
    %c0_4 = arith.constant 0 : index
    %3 = vector.load %arg2[%c0_3, %c0_4] : memref<1x512xf32, #tpu.memory_space<vmem>>, vector<1x512xf32>
    %4 = vector.broadcast %3 : vector<1x512xf32> to vector<2x512xf32>
    %5 = arith.addf %2, %4 : vector<2x512xf32>
    %c0_5 = arith.constant 0 : index
    %c0_6 = arith.constant 0 : index
    %6 = vector.load %arg3[%c0_5, %c0_6] : memref<2x512xf32, #tpu.memory_space<vmem>>, vector<2x512xf32>
    tpu.vector_store %arg3[%c0_5, %c0_6], %5 {strides = array<i32>} : memref<2x512xf32, #tpu.memory_space<vmem>>, vector<2x512xf32>,
    return
  }
}

</mosaic_0001>

<bundles_post_ra>
// kernel: model_forward.2
= control target key start
LH: loop header
LB: loop body
LE: loop exit
PB: predicated region body
PF: predicated region fallthrough
CT: control target
= control target key end

     0   :  { %17 = vsyncpa [#allocation4], 0  ;;  %s1084_s0 = inlined_call_operand.vmem [shape: f32[160,2,4], index: 0, kind: input, shape index: {}]   ;;  %s1085_s1 = inlined_call_operand.hbm [shape: f32[4,32], index: 1, kind: input, shape index: {}]   ;;  %s1086_s2 = inlined_call_operand.hbm [shape: f32[8,32], index: 2, kind: input, shape index: {}]   ;;  %s1087_s3 = inlined_call_operand.vmem [shape: f32[1,32], index: 3, kind: input, shape index: {}]   ;;  %s1088_s4 = inlined_call_operand.hbm [shape: f32[8,32], index: 4, kind: input, shape index: {}]   ;;  %s1089_s5 = inlined_call_operand.hbm [shape: f32[8,32], index: 5, kind: input, shape index: {}]   ;;  %s1090_s6 = inlined_call_operand.vmem [shape: f32[1,32], index: 6, kind: input, shape index: {}]   ;;  %s1091_s7 = inlined_call_operand.vmem [shape: f32[2,2,8], index: 7, kind: input, shape index: {}, may-alias: {7,8}]   ;;  %s1092_s8 = inlined_call_operand.vmem [shape: f32[2,2,8], index: 8, kind: input, shape index: {}, may-alias: {7,8}]   ;;  %s1093_s9 = inlined_call_operand.vmem [shape: f32[160,2,8], index: 9, kind: output, shape index: {0}]   ;;  %s1094_s10 = inlined_call_operand.hbm [shape: f32[2,2,8], index: 10, kind: output, shape index: {1}]   ;;  %s1095_s11 = inlined_call_operand.hbm [shape: f32[2,2,8], index: 11, kind: output, shape index: {2}]  }
   0x1   :  { %18 = vsyncpa [#allocation7], 0 }
   0x2   :  { %19 = vsyncpa [#allocation10], 0 }
   0x3   :  { %20 = vsyncpa [#allocation5], 0 }
   0x4   :  { %21 = vsyncpa [#allocation13], 0  ;;  %s887_s17 = smov [#allocation6]   ;;  %s888_s19 = smov [#allocation3]  }
   0x5   :  { %s40_s18 = sshll.u32 %s887_s17, 4  ;;  %s30_s20 = sshll.u32 %s888_s19, 4  ;;  %s41_s18 = int_to_ptr.vmem [resolvable:$true] %s40_s18  ;;  %s31_s20 = int_to_ptr.vmem [resolvable:$true] %s30_s20 }
   0x6   :  { %s717_s21 = scalar_lea.vmem %s41_s18, 128  ;;  %p722_p1 = scmp.lt.s32.totalorder %s41_s18, %s41_s18 }
   0x7   :  { %p718_p0 = scmp.ne.s32.totalorder %s41_s18, %s717_s21  ;;  %p723_p2 = scmp.lt.s32.totalorder %s717_s21, %s717_s21 }
   0x9   :  { %p724_p3 = por %p723_p2, %p722_p1 }
   0xb   :  { %p725_p4 = pnand %p724_p3, %p718_p0 }
   0xd   :  { %728 = shalt.err (!%p725_p4)
}
   0xe   :  { %43 = dma.hbm_to_vmem [thread:$0]  %s1086_s2, 128, %s41_s18, [#allocation7]  }
   0xf   :  { %s737_s24 = scalar_lea.vmem %s31_s20, 64  ;;  %p742_p6 = scmp.lt.s32.totalorder %s31_s20, %s31_s20 }
  0x10   :  { %p738_p5 = scmp.ne.s32.totalorder %s31_s20, %s737_s24  ;;  %p743_p7 = scmp.lt.s32.totalorder %s737_s24, %s737_s24 }
  0x12   :  { %p744_p8 = por %p743_p7, %p742_p6 }
  0x14   :  { %p745_p9 = pnand %p744_p8, %p738_p5 }
  0x16   :  { %748 = shalt.err (!%p745_p9)
}
  0x17   :  { %33 = dma.hbm_to_vmem [thread:$0]  %s1085_s1, 64, %s31_s20, [#allocation4]  }
  0x18   :  { %s889_s27 = smov [#allocation8]   ;;  %s890_s29 = smov [#allocation9]  }
  0x19   :  { %s52_s28 = sshll.u32 %s889_s27, 4  ;;  %s62_s30 = sshll.u32 %s890_s29, 4  ;;  %s53_s28 = int_to_ptr.vmem [resolvable:$true] %s52_s28  ;;  %s63_s30 = int_to_ptr.vmem [resolvable:$true] %s62_s30 }
  0x1a   :  { %s757_s12 = scalar_lea.vmem %s53_s28, 128  ;;  %p762_p11 = scmp.lt.s32.totalorder %s53_s28, %s53_s28 }
  0x1b   :  { %p758_p10 = scmp.ne.s32.totalorder %s53_s28, %s757_s12  ;;  %p763_p12 = scmp.lt.s32.totalorder %s757_s12, %s757_s12 }
  0x1d   :  { %p764_p13 = por %p763_p12, %p762_p11 }
  0x1f   :  { %p765_p0 = pnand %p764_p13, %p758_p10 }
  0x21   :  { %768 = shalt.err (!%p765_p0)
}
  0x22   :  { %55 = dma.hbm_to_vmem [thread:$0]  %s1088_s4, 128, %s53_s28, [#allocation7]  }
  0x23   :  { %s777_s14 = scalar_lea.vmem %s63_s30, 128  ;;  %p782_p2 = scmp.lt.s32.totalorder %s63_s30, %s63_s30 }
  0x24   :  { %p778_p1 = scmp.ne.s32.totalorder %s63_s30, %s777_s14  ;;  %p783_p3 = scmp.lt.s32.totalorder %s777_s14, %s777_s14 }
  0x26   :  { %p784_p4 = por %p783_p3, %p782_p2 }
  0x28   :  { %p785_p5 = pnand %p784_p4, %p778_p1 }
  0x2a   :  { %788 = shalt.err (!%p785_p5)
}
  0x2b   :  { %65 = dma.hbm_to_vmem [thread:$0]  %s1089_s5, 128, %s63_s30, [#allocation10]  }
  0x2c   :  { %853 = dma.done.wait [#allocation4], 64  }
  0x2d   :  { %854 = vsyncadd [#allocation4], 4294967232 }
  0x2e   :  { %855 = dma.done.wait [#allocation7], 256  }
  0x2f   :  { %856 = vsyncadd [#allocation7], 4294967040 }
  0x30   :  { %857 = dma.done.wait [#allocation10], 128  }
  0x31   :  { %858 = vsyncadd [#allocation10], 4294967168  ;;  %v981_v0 = vld [vmem:[#allocation3] sm:$0xf]  ;;  %v983_v1 = vld [vmem:[#allocation6] sm:$0xff]  ;;  %s1000_s20 = smov 0  }
  0x32   :  { %v988_v2 = vld [vmem:[%s1087_s3] ss:$0 sm:$0xff] }
  0x33   :  { %v87_v3 = vld [vmem:[%s1091_s7] sm:$0x3]  }
  0x34   :  { %v88_v4 = vld [vmem:[%s1092_s8] sm:$0x3]  }
  0x35 LB: > { %vm100_vm0 = vcmask 64512   ;;  %v891_v5 = vmov 0.0   ;;  %vm892_vm1 = vmmov 0   ;;  %vm178_vm2 = vcmask 1043456   ;;  %s584_s3 = sshll.u32 %s873_s20, 1  ;;  %s893_s24 = smov 112   ;;  %s873_s20 = sphi %s1000_s20, %s94_s20   ;;  %v869_v3 = vphi %v87_v3, %v1097_v3   ;;  %v865_v4 = vphi %v88_v4, %v1096_v4  }
  0x36   : > { %603 = vmatprep.subr.mxu0 %v891_v5  ;;  %605 = vmatprep.mubr.msk.f32.mxu0 %vm892_vm1, %v891_v5  ;;  %vm174_vm3 = vcmask 31744   ;;  %s98_s23 = scalar_lea.vmem %s1084_s0, %s584_s3  ;;  %s894_s25 = smov 8   ;;  %vm292_vm4 = vcmask 58368  }
  0x37   : > { %604 = vmatpush3.msra.mxu0 %v983_v1  ;;  %608 = vmatprep.subr.mxu1 %v891_v5  ;;  %v99_v6 = vld [vmem:[%s98_s23] sm:$0x3]  ;;  %s895_s26 = smov 16   ;;  %s896_s27 = smov 120  }
  0x38   : > { %606 = vmatmul.mubr.msk.f32.vlgmr.msra.gmra.mxu0 %vm100_vm0, %v869_v3  ;;  %609 = vmatpush3.msk.msra.mxu1 %vm178_vm2, %v981_v0  ;;  %s897_s28 = smov 104   ;;  %s291_s29 = scalar_lea.vmem [#allocation2], %s584_s3 }
  0x39   : > { %610 = vmatprep.mubr.msk.f32.mxu1 %vm892_vm1, %v891_v5  ;;  %s94_s20 = sadd.s32 1, %s873_s20  }
  0x3a   : > { %611 = vmatmul.mubr.msk.f32.vlgmr.msra.gmra.mxu1 %vm174_vm3, %v99_v6  ;;  %p91_p6 = scmp.ge.s32.totalorder %s94_s20, 160  }
  0x3b   :  { %v1029_v30 = vld [vmem:[#allocation8] sm:$0xff] (%p91_p6)  ;;  %v1031_v31 = vld [vmem:[#allocation9] sm:$0xff] (%p91_p6)  ;;  %v1036_v32 = vld [vmem:[%s1090_s6] ss:$0 sm:$0xff] (%p91_p6)  ;;  %s1048_s0 = smov (%p91_p6), 0  }
  0x3c   :  { %v589_v33 = vld [vmem:[%s1091_s7 + $0x2] sm:$0x3] (%p91_p6)  }
  0x3d   :  { %v590_v34 = vld [vmem:[%s1092_s8 + $0x2] sm:$0x3] (%p91_p6)  }
  0xf8   : > { %v170_v7 = vpop.f32.mrf.mxu0 }
  0xfa   : > { %v607_v8 = vpop.f32.mrf.mxu0  ;;  %v248_v9 = vpop.f32.mrf.mxu1 }
  0xfb   : > { %v249_v10 = vadd.f32 %v248_v9, %v170_v7 }
  0xfc   : > { %v612_v11 = vpop.f32.mrf.mxu1 }
  0xfd   : > { %v258_v12 = vadd.f32 %v988_v2, %v249_v10 }
  0xff   : > { %693 = vtanh.f32 %v258_v12  ;;  %v259_v14 = vsub.f32 0.0, %v258_v12 }
 0x101   : > { %v260_v15 = vmul.f32 1.442695, %v259_v14 }
 0x103   : > { %695 = vpow2.f32 %v260_v15 }
 0x10c   : > { %v694_v13 = vpop.eup %693 }
 0x10d   : > { %272 = vrot.lane.b32.xlu0 %v694_v13, %s893_s24 }
 0x110   : > { %v696_v16 = vpop.eup %695 }
 0x111   : > { %267 = vrot.lane.b32.xlu0 %v865_v4, %s894_s25  ;;  %v262_v17 = vadd.f32 1.0, %v696_v16 }
 0x113   : > { %697 = vrcp.f32 %v262_v17 }
 0x120   : > { %v698_v18 = vpop.eup %697 }
 0x17f   : > { %v273_v19 = vpop.permute.xlu0 %272 }
 0x180   : > { %v275_v20 = vmul.f32 %v698_v18, %v273_v19 }
 0x182   : > { %277 = vrot.lane.b32.xlu1 %v275_v20, %s894_s25 }
 0x183   : > { %v268_v21 = vpop.permute.xlu0 %267 }
 0x184   : > { %v270_v22 = vmul.f32 %v698_v18, %v268_v21 }
 0x1f4   : > { %v278_v23 = vpop.permute.xlu1 %277 }
 0x1f5   : > { %v280_v24 = vadd.f32 %v278_v23, %v270_v22 }
 0x1f7   : > { %699 = vtanh.f32 %v280_v24 }
 0x204   : > { %v700_v25 = vpop.eup %699 }
 0x205   : > { %283 = vrot.lane.b32.xlu1 %v700_v25, %s895_s26 }
 0x209   : > { %295 = vrot.lane.b32.xlu1 %v280_v24, %s896_s27 }
 0x277   : > { %v284_v26 = vpop.permute.xlu1 %283 }
 0x278   : > { %v286_v27 = vmul.f32 %v698_v18, %v284_v26 }
 0x27a   : > { %288 = vrot.lane.b32.xlu0 %v286_v27, %s897_s28 }
 0x27b   : > { %v296_v28 = vpop.permute.xlu1 %295  }
 0x27c   : > { %v1096_v4 = vmov %v296_v28  ;;  %300 = vst.msk [vmem:[#allocation12] sm:$0x3] (%p91_p6), %vm292_vm4, %v296_v28 }
 0x2e9   :  { %93 = sbr.rel (!%p91_p6) target bundleno = 53 (0x35), region = 110 }
 0x2ec   : > { %v289_v29 = vpop.permute.xlu0 %288  }
 0x2ed   : > { %293 = vst.msk [vmem:[%s291_s29] sm:$0x3] %vm292_vm4, %v289_v29  ;;  %v1097_v3 = vmov %v289_v29  ;;  %299 = vst.msk [vmem:[#allocation11] sm:$0x3] (%p91_p6), %vm292_vm4, %v289_v29 }
 0x2ee LB: > { %v898_v35 = vmov 0.0   ;;  %vm899_vm5 = vmmov 0   ;;  %s591_s6 = sshll.u32 %s885_s0, 1  ;;  %s900_s8 = smov 112   ;;  %s885_s0 = sphi %s1048_s0, %s313_s0   ;;  %v881_v33 = vphi %v589_v33, %v1099_v33   ;;  %v877_v34 = vphi %v590_v34, %v1098_v34  }
 0x2ef   : > { %613 = vmatprep.subr.mxu0 %v898_v35  ;;  %615 = vmatprep.mubr.msk.f32.mxu0 %vm899_vm5, %v898_v35  ;;  %s317_s7 = scalar_lea.vmem [#allocation2], %s591_s6  ;;  %s901_s15 = smov 8  }
 0x2f0   : > { %614 = vmatpush3.msra.mxu0 %v1031_v31  ;;  %618 = vmatprep.subr.mxu1 %v898_v35  ;;  %s902_s4 = smov 16   ;;  %s903_s16 = smov 120  }
 0x2f1   : > { %616 = vmatmul.mubr.msk.f32.vlgmr.msra.gmra.mxu0 %vm100_vm0, %v881_v33  ;;  %619 = vmatpush3.msra.mxu1 %v1029_v30  ;;  %s904_s17 = smov 104   ;;  %s505_s19 = scalar_lea.vmem %s1093_s9, %s591_s6 }
 0x2f2   : > { %620 = vmatprep.mubr.msk.f32.mxu1 %vm899_vm5, %v898_v35  ;;  %s313_s0 = sadd.s32 1, %s885_s0  }
 0x2f3   : > { %p310_p7 = scmp.ge.s32.totalorder %s313_s0, 160  }
 0x2f4   : > { %v318_v36 = vld [vmem:[%s317_s7] sm:$0x3]  ;;  %s905_s20 = smov (%p310_p7), [#allocation11]  }
 0x2f5   : > { %621 = vmatmul.mubr.msk.f32.vlgmr.msra.gmra.mxu1 %vm100_vm0, %v318_v36  ;;  %s522_s3 = sshll.u32 (%p310_p7), %s905_s20, 4  ;;  %s523_s3 = int_to_ptr.vmem [resolvable:$true] %s522_s3 }
 0x2f6   :  { %s789_s21 = scalar_lea.vmem (%p310_p7), %s523_s3, 64  ;;  %p794_p9 = scmp.lt.s32.totalorder (%p310_p7), %s523_s3, %s523_s3 }
 0x2f7   :  { %p790_p8 = scmp.ne.s32.totalorder (%p310_p7), %s523_s3, %s789_s21  ;;  %p795_p10 = scmp.lt.s32.totalorder (%p310_p7), %s789_s21, %s789_s21 }
 0x2f9   :  { %p796_p11 = por (%p310_p7), %p795_p10, %p794_p9 }
 0x2fb   :  { %p797_p12 = pnand (%p310_p7), %p796_p11, %p790_p8 }
 0x3b1   : > { %v389_v37 = vpop.f32.mrf.mxu0 }
 0x3b3   : > { %v617_v38 = vpop.f32.mrf.mxu0 }
 0x3b5   : > { %v462_v39 = vpop.f32.mrf.mxu1 }
 0x3b6   : > { %v463_v40 = vadd.f32 %v462_v39, %v389_v37 }
 0x3b7   : > { %v622_v41 = vpop.f32.mrf.mxu1 }
 0x3b8   : > { %v472_v42 = vadd.f32 %v1036_v32, %v463_v40 }
 0x3ba   : > { %701 = vtanh.f32 %v472_v42  ;;  %v473_v44 = vsub.f32 0.0, %v472_v42 }
 0x3bc   : > { %v474_v45 = vmul.f32 1.442695, %v473_v44 }
 0x3be   : > { %703 = vpow2.f32 %v474_v45 }
 0x3c7   : > { %v702_v43 = vpop.eup %701 }
 0x3c8   : > { %486 = vrot.lane.b32.xlu0 %v702_v43, %s900_s8 }
 0x3cb   : > { %v704_v46 = vpop.eup %703 }
 0x3cc   : > { %481 = vrot.lane.b32.xlu0 %v877_v34, %s901_s15  ;;  %v476_v47 = vadd.f32 1.0, %v704_v46 }
 0x3ce   : > { %705 = vrcp.f32 %v476_v47 }
 0x3db   : > { %v706_v48 = vpop.eup %705 }
 0x43a   : > { %v487_v49 = vpop.permute.xlu0 %486 }
 0x43b   : > { %v489_v50 = vmul.f32 %v706_v48, %v487_v49 }
 0x43d   : > { %491 = vrot.lane.b32.xlu1 %v489_v50, %s901_s15 }
 0x43e   : > { %v482_v51 = vpop.permute.xlu0 %481 }
 0x43f   : > { %v484_v52 = vmul.f32 %v706_v48, %v482_v51 }
 0x4af   : > { %v492_v53 = vpop.permute.xlu1 %491 }
 0x4b0   : > { %v494_v54 = vadd.f32 %v492_v53, %v484_v52 }
 0x4b2   : > { %707 = vtanh.f32 %v494_v54 }
 0x4bf   : > { %v708_v55 = vpop.eup %707 }
 0x4c0   : > { %497 = vrot.lane.b32.xlu1 %v708_v55, %s902_s4 }
 0x4c4   : > { %508 = vrot.lane.b32.xlu1 %v494_v54, %s903_s16 }
 0x532   : > { %v498_v56 = vpop.permute.xlu1 %497 }
 0x533   : > { %v500_v57 = vmul.f32 %v706_v48, %v498_v56 }
 0x535   : > { %502 = vrot.lane.b32.xlu0 %v500_v57, %s904_s17 }
 0x536   : > { %v509_v58 = vpop.permute.xlu1 %508  }
 0x537   : > { %v1098_v34 = vmov %v509_v58  ;;  %514 = vst.msk [vmem:[#allocation12 + $0x2] sm:$0x3] (%p310_p7), %vm292_vm4, %v509_v58 }
 0x5a4   :  { %312 = sbr.rel (!%p310_p7) target bundleno = 750 (0x2ee), region = 121 }
 0x5a7   : > { %v503_v59 = vpop.permute.xlu0 %502  }
 0x5a8   : > { %506 = vst.msk [vmem:[%s505_s19] sm:$0x3] %vm292_vm4, %v503_v59  ;;  %v1099_v33 = vmov %v503_v59  ;;  %512 = vst.msk [vmem:[#allocation11 + $0x2] sm:$0x3] (%p310_p7), %vm292_vm4, %v503_v59 }
 0x5a9   :  { %800 = shalt.err (!%p797_p12)
}
 0x5aa   :  { %s906_s22 = smov 32   ;;  %s907_s23 = smov 2  }
 0x5ab   :  { %528 = dma.vmem_to_hbm [thread:$0]  %s523_s3, 64, %s1094_s10, [#allocation5], %s906_s22, %s906_s22, %s907_s23  }
 0x5ac   :  { %s908_s9 = smov [#allocation12]  }
 0x5ad   :  { %s534_s26 = sshll.u32 %s908_s9, 4  ;;  %s535_s26 = int_to_ptr.vmem [resolvable:$true] %s534_s26 }
 0x5ae   :  { %s809_s27 = scalar_lea.vmem %s535_s26, 64  ;;  %p814_p0 = scmp.lt.s32.totalorder %s535_s26, %s535_s26 }
 0x5af   :  { %p810_p13 = scmp.ne.s32.totalorder %s535_s26, %s809_s27  ;;  %p815_p1 = scmp.lt.s32.totalorder %s809_s27, %s809_s27 }
 0x5b1   :  { %p816_p2 = por %p815_p1, %p814_p0 }
 0x5b3   :  { %p817_p3 = pnand %p816_p2, %p810_p13 }
 0x5b5   :  { %820 = shalt.err (!%p817_p3)
}
 0x5b6   :  { %540 = dma.vmem_to_hbm [thread:$0]  %s535_s26, 64, %s1095_s11, [#allocation13], %s906_s22, %s906_s22, %s907_s23  }
 0x5b7   :  { %859 = dma.done.wait [#allocation5], 64  }
 0x5b8   :  { %860 = vsyncadd [#allocation5], 4294967232 }
 0x5b9   :  { %861 = dma.done.wait [#allocation13], 64  }
 0x5ba   :  { %862 = vsyncadd [#allocation13], 4294967232 }
 0x5bb   :  { %549 = vsyncpa [#allocation4], 1 }
 0x5bc   :  { %550 = vsyncpa [#allocation7], 1 }
 0x5bd   :  { %551 = vsyncpa [#allocation10], 1 }
 0x5be   :  { %552 = vsyncpa [#allocation5], 1 }
 0x5bf   :  { %553 = vsyncpa [#allocation13], 1 }

// kernel: model_forward.3
= control target key start
LH: loop header
LB: loop body
LE: loop exit
PB: predicated region body
PF: predicated region fallthrough
CT: control target
= control target key end

     0   :  { %s3529_s0 = inlined_call_operand.vmem [shape: f32[2,1280], index: 0, kind: input, shape index: {}]   ;;  %s3530_s1 = inlined_call_operand.vmem [shape: f32[1280,512], index: 1, kind: input, shape index: {}]   ;;  %s3531_s2 = inlined_call_operand.vmem [shape: f32[1,512], index: 2, kind: input, shape index: {}]   ;;  %s3532_s3 = inlined_call_operand.hbm [shape: f32[2,512], index: 3, kind: output, shape index: {}]  }
   0x1   :  { %v79_v0 = vld [vmem:[%s3530_s1 + $0x1e8] sm:$0xff]  ;;  %v78_v2 = vld [vmem:[%s3530_s1 + $0x1e0] sm:$0xff] }
   0x2   :  { %v207_v1 = vld [vmem:[%s3530_s1 + $0x5e8] sm:$0xff]  ;;  %735 = vmatprep.subr.mxu0 %v79_v0  ;;  %v206_v3 = vld [vmem:[%s3530_s1 + $0x5e0] sm:$0xff] }
   0x3   :  { %806 = vmatprep.subr.mxu1 %v207_v1  ;;  %v75_v4 = vld [vmem:[%s3530_s1 + $0x1c8] sm:$0xff]  ;;  %736 = vmatpush1.msra.mxu0 %v78_v2  ;;  %v74_v6 = vld [vmem:[%s3530_s1 + $0x1c0] sm:$0xff] }
   0x4   :  { %v203_v5 = vld [vmem:[%s3530_s1 + $0x5c8] sm:$0xff]  ;;  %807 = vmatpush1.msra.mxu1 %v206_v3  ;;  %v202_v7 = vld [vmem:[%s3530_s1 + $0x5c0] sm:$0xff]  ;;  %737 = vmatprep.subr.mxu0 %v75_v4 }
   0x5   :  { %v71_v8 = vld [vmem:[%s3530_s1 + $0x1a8] sm:$0xff]  ;;  %808 = vmatprep.subr.mxu1 %v203_v5  ;;  %v70_v10 = vld [vmem:[%s3530_s1 + $0x1a0] sm:$0xff]  ;;  %738 = vmatpush1.msra.mxu0 %v74_v6 }
   0x6   :  { %v199_v9 = vld [vmem:[%s3530_s1 + $0x5a8] sm:$0xff]  ;;  %v198_v11 = vld [vmem:[%s3530_s1 + $0x5a0] sm:$0xff]  ;;  %809 = vmatpush1.msra.mxu1 %v202_v7  ;;  %739 = vmatprep.subr.mxu0 %v71_v8 }
   0x7   :  { %v67_v12 = vld [vmem:[%s3530_s1 + $0x188] sm:$0xff]  ;;  %810 = vmatprep.subr.mxu1 %v199_v9  ;;  %v66_v14 = vld [vmem:[%s3530_s1 + $0x180] sm:$0xff]  ;;  %740 = vmatpush1.msra.mxu0 %v70_v10 }
   0x8   :  { %v195_v13 = vld [vmem:[%s3530_s1 + $0x588] sm:$0xff]  ;;  %v194_v15 = vld [vmem:[%s3530_s1 + $0x580] sm:$0xff]  ;;  %811 = vmatpush1.msra.mxu1 %v198_v11  ;;  %741 = vmatprep.subr.mxu0 %v67_v12 }
   0x9   :  { %v63_v16 = vld [vmem:[%s3530_s1 + $0x168] sm:$0xff]  ;;  %812 = vmatprep.subr.mxu1 %v195_v13  ;;  %v62_v18 = vld [vmem:[%s3530_s1 + $0x160] sm:$0xff]  ;;  %742 = vmatpush1.msra.mxu0 %v66_v14 }
   0xa   :  { %v191_v17 = vld [vmem:[%s3530_s1 + $0x568] sm:$0xff]  ;;  %v190_v19 = vld [vmem:[%s3530_s1 + $0x560] sm:$0xff]  ;;  %813 = vmatpush1.msra.mxu1 %v194_v15  ;;  %743 = vmatprep.subr.mxu0 %v63_v16 }
   0xb   :  { %v59_v20 = vld [vmem:[%s3530_s1 + $0x148] sm:$0xff]  ;;  %814 = vmatprep.subr.mxu1 %v191_v17  ;;  %v58_v22 = vld [vmem:[%s3530_s1 + $0x140] sm:$0xff]  ;;  %744 = vmatpush1.msra.mxu0 %v62_v18 }
   0xc   :  { %v187_v21 = vld [vmem:[%s3530_s1 + $0x548] sm:$0xff]  ;;  %v186_v23 = vld [vmem:[%s3530_s1 + $0x540] sm:$0xff]  ;;  %815 = vmatpush1.msra.mxu1 %v190_v19  ;;  %745 = vmatprep.subr.mxu0 %v59_v20 }
   0xd   :  { %v55_v24 = vld [vmem:[%s3530_s1 + $0x128] sm:$0xff]  ;;  %816 = vmatprep.subr.mxu1 %v187_v21  ;;  %v54_v26 = vld [vmem:[%s3530_s1 + $0x120] sm:$0xff]  ;;  %746 = vmatpush1.msra.mxu0 %v58_v22 }
   0xe   :  { %v183_v25 = vld [vmem:[%s3530_s1 + $0x528] sm:$0xff]  ;;  %v182_v27 = vld [vmem:[%s3530_s1 + $0x520] sm:$0xff]  ;;  %817 = vmatpush1.msra.mxu1 %v186_v23  ;;  %747 = vmatprep.subr.mxu0 %v55_v24 }
   0xf   :  { %v51_v28 = vld [vmem:[%s3530_s1 + $0x108] sm:$0xff]  ;;  %818 = vmatprep.subr.mxu1 %v183_v25  ;;  %v50_v30 = vld [vmem:[%s3530_s1 + $0x100] sm:$0xff]  ;;  %748 = vmatpush1.msra.mxu0 %v54_v26 }
  0x10   :  { %v179_v29 = vld [vmem:[%s3530_s1 + $0x508] sm:$0xff]  ;;  %v178_v31 = vld [vmem:[%s3530_s1 + $0x500] sm:$0xff]  ;;  %819 = vmatpush1.msra.mxu1 %v182_v27  ;;  %749 = vmatprep.subr.mxu0 %v51_v28 }
  0x11   :  { %v47_v32 = vld [vmem:[%s3530_s1 + $0xe8] sm:$0xff]  ;;  %820 = vmatprep.subr.mxu1 %v179_v29  ;;  %v46_v34 = vld [vmem:[%s3530_s1 + $0xe0] sm:$0xff]  ;;  %750 = vmatpush1.msra.mxu0 %v50_v30  ;;  %v660_v30 = vlaneseq }
  0x12   :  { %v175_v33 = vld [vmem:[%s3530_s1 + $0x4e8] sm:$0xff]  ;;  %v174_v35 = vld [vmem:[%s3530_s1 + $0x4e0] sm:$0xff]  ;;  %821 = vmatpush1.msra.mxu1 %v178_v31  ;;  %751 = vmatprep.subr.mxu0 %v47_v32  ;;  %v1510_v31 = vmov 1983009808  }
  0x13   :  { %v43_v36 = vld [vmem:[%s3530_s1 + $0xc8] sm:$0xff]  ;;  %822 = vmatprep.subr.mxu1 %v175_v33  ;;  %v42_v38 = vld [vmem:[%s3530_s1 + $0xc0] sm:$0xff]  ;;  %752 = vmatpush1.msra.mxu0 %v46_v34  ;;  %v685_v32 = vunpack.c.l.s4 %v1510_v31 }
  0x14   :  { %v171_v37 = vld [vmem:[%s3530_s1 + $0x4c8] sm:$0xff]  ;;  %v170_v39 = vld [vmem:[%s3530_s1 + $0x4c0] sm:$0xff]  ;;  %823 = vmatpush1.msra.mxu1 %v174_v35  ;;  %753 = vmatprep.subr.mxu0 %v43_v36 }
  0x15   :  { %v39_v40 = vld [vmem:[%s3530_s1 + $0xa8] sm:$0xff]  ;;  %824 = vmatprep.subr.mxu1 %v171_v37  ;;  %v38_v42 = vld [vmem:[%s3530_s1 + $0xa0] sm:$0xff]  ;;  %754 = vmatpush1.msra.mxu0 %v42_v38 }
  0x16   :  { %v167_v41 = vld [vmem:[%s3530_s1 + $0x4a8] sm:$0xff]  ;;  %v166_v43 = vld [vmem:[%s3530_s1 + $0x4a0] sm:$0xff]  ;;  %825 = vmatpush1.msra.mxu1 %v170_v39  ;;  %755 = vmatprep.subr.mxu0 %v39_v40 }
  0x17   :  { %v35_v44 = vld [vmem:[%s3530_s1 + $0x88] sm:$0xff]  ;;  %826 = vmatprep.subr.mxu1 %v167_v41  ;;  %v34_v46 = vld [vmem:[%s3530_s1 + $0x80] sm:$0xff]  ;;  %756 = vmatpush1.msra.mxu0 %v38_v42  ;;  %v1838_v41 = vshrl.u32 %v660_v30, 7  ;;  %v686_v42 = vunpack.c.0.s8 %v685_v32 }
  0x18   :  { %v163_v45 = vld [vmem:[%s3530_s1 + $0x488] sm:$0xff]  ;;  %v162_v47 = vld [vmem:[%s3530_s1 + $0x480] sm:$0xff]  ;;  %827 = vmatpush1.msra.mxu1 %v166_v43  ;;  %757 = vmatprep.subr.mxu0 %v35_v44 }
  0x19   :  { %v31_v48 = vld [vmem:[%s3530_s1 + $0x68] sm:$0xff]  ;;  %828 = vmatprep.subr.mxu1 %v163_v45  ;;  %v30_v50 = vld [vmem:[%s3530_s1 + $0x60] sm:$0xff]  ;;  %758 = vmatpush1.msra.mxu0 %v34_v46 }
  0x1a   :  { %v159_v49 = vld [vmem:[%s3530_s1 + $0x468] sm:$0xff]  ;;  %v158_v51 = vld [vmem:[%s3530_s1 + $0x460] sm:$0xff]  ;;  %829 = vmatpush1.msra.mxu1 %v162_v47  ;;  %759 = vmatprep.subr.mxu0 %v31_v48 }
  0x1b   :  { %v27_v52 = vld [vmem:[%s3530_s1 + $0x48] sm:$0xff]  ;;  %830 = vmatprep.subr.mxu1 %v159_v49  ;;  %v26_v54 = vld [vmem:[%s3530_s1 + $0x40] sm:$0xff]  ;;  %760 = vmatpush1.msra.mxu0 %v30_v50 }
  0x1c   :  { %v155_v53 = vld [vmem:[%s3530_s1 + $0x448] sm:$0xff]  ;;  %v154_v55 = vld [vmem:[%s3530_s1 + $0x440] sm:$0xff]  ;;  %831 = vmatpush1.msra.mxu1 %v158_v51  ;;  %761 = vmatprep.subr.mxu0 %v27_v52  ;;  %v1868_v52 = vsub.s32 %v686_v42, %v1838_v41 }
  0x1d   :  { %v23_v56 = vld [vmem:[%s3530_s1 + $0x28] sm:$0xff]  ;;  %832 = vmatprep.subr.mxu1 %v155_v53  ;;  %v22_v58 = vld [vmem:[%s3530_s1 + $0x20] sm:$0xff]  ;;  %762 = vmatpush1.msra.mxu0 %v26_v54 }
  0x1e   :  { %v151_v57 = vld [vmem:[%s3530_s1 + $0x428] sm:$0xff]  ;;  %v150_v59 = vld [vmem:[%s3530_s1 + $0x420] sm:$0xff]  ;;  %833 = vmatpush1.msra.mxu1 %v154_v55  ;;  %763 = vmatprep.subr.mxu0 %v23_v56 }
  0x1f   :  { %v19_v60 = vld [vmem:[%s3530_s1 + $0x8] sm:$0xff]  ;;  %834 = vmatprep.subr.mxu1 %v151_v57  ;;  %v18_v62 = vld [vmem:[%s3530_s1] sm:$0xff]  ;;  %764 = vmatpush1.msra.mxu0 %v22_v58 }
  0x20   :  { %v147_v61 = vld [vmem:[%s3530_s1 + $0x408] sm:$0xff]  ;;  %v146_v63 = vld [vmem:[%s3530_s1 + $0x400] sm:$0xff]  ;;  %835 = vmatpush1.msra.mxu1 %v150_v59  ;;  %765 = vmatprep.subr.mxu0 %v19_v60 }
  0x21   :  { %v143_v0 = vld [vmem:[%s3530_s1 + $0x3e8] sm:$0xff]  ;;  %836 = vmatprep.subr.mxu1 %v147_v61  ;;  %v142_v2 = vld [vmem:[%s3530_s1 + $0x3e0] sm:$0xff]  ;;  %766 = vmatpush1.msra.mxu0 %v18_v62 }
  0x22   :  { %v271_v1 = vld [vmem:[%s3530_s1 + $0x7e8] sm:$0xff]  ;;  %v270_v3 = vld [vmem:[%s3530_s1 + $0x7e0] sm:$0xff]  ;;  %837 = vmatpush1.msra.mxu1 %v146_v63  ;;  %767 = vmatprep.subr.mxu0 %v143_v0 }
  0x23   :  { %v139_v4 = vld [vmem:[%s3530_s1 + $0x3c8] sm:$0xff]  ;;  %838 = vmatprep.subr.mxu1 %v271_v1  ;;  %v138_v6 = vld [vmem:[%s3530_s1 + $0x3c0] sm:$0xff]  ;;  %768 = vmatpush2.msra.mxu0 %v142_v2 }
  0x24   :  { %v267_v5 = vld [vmem:[%s3530_s1 + $0x7c8] sm:$0xff]  ;;  %v266_v7 = vld [vmem:[%s3530_s1 + $0x7c0] sm:$0xff]  ;;  %839 = vmatpush2.msra.mxu1 %v270_v3  ;;  %769 = vmatprep.subr.mxu0 %v139_v4 }
  0x25   :  { %v135_v8 = vld [vmem:[%s3530_s1 + $0x3a8] sm:$0xff]  ;;  %840 = vmatprep.subr.mxu1 %v267_v5  ;;  %v134_v10 = vld [vmem:[%s3530_s1 + $0x3a0] sm:$0xff]  ;;  %770 = vmatpush2.msra.mxu0 %v138_v6 }
  0x26   :  { %v263_v9 = vld [vmem:[%s3530_s1 + $0x7a8] sm:$0xff]  ;;  %v262_v11 = vld [vmem:[%s3530_s1 + $0x7a0] sm:$0xff]  ;;  %841 = vmatpush2.msra.mxu1 %v266_v7  ;;  %771 = vmatprep.subr.mxu0 %v135_v8 }
  0x27   :  { %v131_v12 = vld [vmem:[%s3530_s1 + $0x388] sm:$0xff]  ;;  %842 = vmatprep.subr.mxu1 %v263_v9  ;;  %v130_v14 = vld [vmem:[%s3530_s1 + $0x380] sm:$0xff]  ;;  %772 = vmatpush2.msra.mxu0 %v134_v10 }
  0x28   :  { %v259_v13 = vld [vmem:[%s3530_s1 + $0x788] sm:$0xff]  ;;  %v258_v15 = vld [vmem:[%s3530_s1 + $0x780] sm:$0xff]  ;;  %843 = vmatpush2.msra.mxu1 %v262_v11  ;;  %773 = vmatprep.subr.mxu0 %v131_v12 }
  0x29   :  { %v127_v16 = vld [vmem:[%s3530_s1 + $0x368] sm:$0xff]  ;;  %844 = vmatprep.subr.mxu1 %v259_v13  ;;  %v126_v18 = vld [vmem:[%s3530_s1 + $0x360] sm:$0xff]  ;;  %774 = vmatpush2.msra.mxu0 %v130_v14 }
  0x2a   :  { %v255_v17 = vld [vmem:[%s3530_s1 + $0x768] sm:$0xff]  ;;  %v254_v19 = vld [vmem:[%s3530_s1 + $0x760] sm:$0xff]  ;;  %845 = vmatpush2.msra.mxu1 %v258_v15  ;;  %775 = vmatprep.subr.mxu0 %v127_v16 }
  0x2b   :  { %v123_v20 = vld [vmem:[%s3530_s1 + $0x348] sm:$0xff]  ;;  %846 = vmatprep.subr.mxu1 %v255_v17  ;;  %v122_v22 = vld [vmem:[%s3530_s1 + $0x340] sm:$0xff]  ;;  %776 = vmatpush2.msra.mxu0 %v126_v18 }
  0x2c   :  { %v251_v21 = vld [vmem:[%s3530_s1 + $0x748] sm:$0xff]  ;;  %v250_v23 = vld [vmem:[%s3530_s1 + $0x740] sm:$0xff]  ;;  %847 = vmatpush2.msra.mxu1 %v254_v19  ;;  %777 = vmatprep.subr.mxu0 %v123_v20 }
  0x2d   :  { %v119_v24 = vld [vmem:[%s3530_s1 + $0x328] sm:$0xff]  ;;  %848 = vmatprep.subr.mxu1 %v251_v21  ;;  %v118_v26 = vld [vmem:[%s3530_s1 + $0x320] sm:$0xff]  ;;  %778 = vmatpush2.msra.mxu0 %v122_v22 }
  0x2e   :  { %v247_v25 = vld [vmem:[%s3530_s1 + $0x728] sm:$0xff]  ;;  %v246_v27 = vld [vmem:[%s3530_s1 + $0x720] sm:$0xff]  ;;  %849 = vmatpush2.msra.mxu1 %v250_v23  ;;  %779 = vmatprep.subr.mxu0 %v119_v24 }
  0x2f   :  { %v115_v28 = vld [vmem:[%s3530_s1 + $0x308] sm:$0xff]  ;;  %850 = vmatprep.subr.mxu1 %v247_v25  ;;  %v114_v33 = vld [vmem:[%s3530_s1 + $0x300] sm:$0xff]  ;;  %780 = vmatpush2.msra.mxu0 %v118_v26 }
  0x30   :  { %v243_v29 = vld [vmem:[%s3530_s1 + $0x708] sm:$0xff]  ;;  %v242_v34 = vld [vmem:[%s3530_s1 + $0x700] sm:$0xff]  ;;  %851 = vmatpush2.msra.mxu1 %v246_v27  ;;  %781 = vmatprep.subr.mxu0 %v115_v28 }
  0x31   :  { %v111_v35 = vld [vmem:[%s3530_s1 + $0x2e8] sm:$0xff]  ;;  %852 = vmatprep.subr.mxu1 %v243_v29  ;;  %v110_v37 = vld [vmem:[%s3530_s1 + $0x2e0] sm:$0xff]  ;;  %782 = vmatpush2.msra.mxu0 %v114_v33 }
  0x32   :  { %v239_v36 = vld [vmem:[%s3530_s1 + $0x6e8] sm:$0xff]  ;;  %v238_v38 = vld [vmem:[%s3530_s1 + $0x6e0] sm:$0xff]  ;;  %853 = vmatpush2.msra.mxu1 %v242_v34  ;;  %783 = vmatprep.subr.mxu0 %v111_v35 }
  0x33   :  { %v107_v39 = vld [vmem:[%s3530_s1 + $0x2c8] sm:$0xff]  ;;  %854 = vmatprep.subr.mxu1 %v239_v36  ;;  %v106_v43 = vld [vmem:[%s3530_s1 + $0x2c0] sm:$0xff]  ;;  %784 = vmatpush2.msra.mxu0 %v110_v37 }
  0x34   :  { %v235_v40 = vld [vmem:[%s3530_s1 + $0x6c8] sm:$0xff]  ;;  %v234_v44 = vld [vmem:[%s3530_s1 + $0x6c0] sm:$0xff]  ;;  %855 = vmatpush2.msra.mxu1 %v238_v38  ;;  %785 = vmatprep.subr.mxu0 %v107_v39 }
  0x35   :  { %v103_v45 = vld [vmem:[%s3530_s1 + $0x2a8] sm:$0xff]  ;;  %856 = vmatprep.subr.mxu1 %v235_v40  ;;  %v102_v47 = vld [vmem:[%s3530_s1 + $0x2a0] sm:$0xff]  ;;  %786 = vmatpush2.msra.mxu0 %v106_v43 }
  0x36   :  { %v231_v46 = vld [vmem:[%s3530_s1 + $0x6a8] sm:$0xff]  ;;  %v230_v48 = vld [vmem:[%s3530_s1 + $0x6a0] sm:$0xff]  ;;  %857 = vmatpush2.msra.mxu1 %v234_v44  ;;  %787 = vmatprep.subr.mxu0 %v103_v45 }
  0x37   :  { %v15_v49 = vld [vmem:[%s3529_s0] sm:$0xff]  ;;  %v99_v50 = vld [vmem:[%s3530_s1 + $0x288] sm:$0xff]  ;;  %858 = vmatprep.subr.mxu1 %v231_v46  ;;  %788 = vmatpush2.msra.mxu0 %v102_v47 }
  0x38   :  { %v227_v51 = vld [vmem:[%s3530_s1 + $0x688] sm:$0xff]  ;;  %v98_v53 = vld [vmem:[%s3530_s1 + $0x280] sm:$0xff]  ;;  %859 = vmatpush2.msra.mxu1 %v230_v48  ;;  %v683_v57 = vcombine.high %v15_v49, %v15_v49  ;;  %789 = vmatprep.subr.mxu0 %v99_v50  ;;  %v1895_v62 = vrot.slane %v15_v49, %v1868_v52 }
  0x39   :  { %v226_v54 = vld [vmem:[%s3530_s1 + $0x680] sm:$0xff]  ;;  %v95_v55 = vld [vmem:[%s3530_s1 + $0x268] sm:$0xff]  ;;  %860 = vmatprep.subr.mxu1 %v227_v51  ;;  %790 = vmatpush2.msra.mxu0 %v98_v53 }
  0x3a   :  { %v223_v56 = vld [vmem:[%s3530_s1 + $0x668] sm:$0xff]  ;;  %v94_v58 = vld [vmem:[%s3530_s1 + $0x260] sm:$0xff]  ;;  %861 = vmatpush2.msra.mxu1 %v226_v54  ;;  %791 = vmatprep.subr.mxu0 %v95_v55  ;;  %v1910_v3 = vrot.slane %v683_v57, %v1868_v52  ;;  %v1926_v8 = vcombine.high %v1895_v62, %v1895_v62 }
  0x3b   :  { %v222_v59 = vld [vmem:[%s3530_s1 + $0x660] sm:$0xff]  ;;  %v91_v60 = vld [vmem:[%s3530_s1 + $0x248] sm:$0xff]  ;;  %862 = vmatprep.subr.mxu1 %v223_v56  ;;  %792 = vmatpush2.msra.mxu0 %v94_v58 }
  0x3c   :  { %v219_v61 = vld [vmem:[%s3530_s1 + $0x648] sm:$0xff]  ;;  %v90_v63 = vld [vmem:[%s3530_s1 + $0x240] sm:$0xff]  ;;  %863 = vmatpush2.msra.mxu1 %v222_v59  ;;  %793 = vmatprep.subr.mxu0 %v91_v60  ;;  %v1936_v11 = vcombine.high %v1910_v3, %v1910_v3 }
  0x3d   :  { %v218_v0 = vld [vmem:[%s3530_s1 + $0x640] sm:$0xff]  ;;  %v87_v1 = vld [vmem:[%s3530_s1 + $0x228] sm:$0xff]  ;;  %864 = vmatprep.subr.mxu1 %v219_v61  ;;  %794 = vmatpush2.msra.mxu0 %v90_v63 }
  0x3e   :  { %v215_v2 = vld [vmem:[%s3530_s1 + $0x628] sm:$0xff]  ;;  %v86_v4 = vld [vmem:[%s3530_s1 + $0x220] sm:$0xff]  ;;  %865 = vmatpush2.msra.mxu1 %v218_v0  ;;  %795 = vmatprep.subr.mxu0 %v87_v1 }
  0x3f   :  { %v214_v5 = vld [vmem:[%s3530_s1 + $0x620] sm:$0xff]  ;;  %v83_v6 = vld [vmem:[%s3530_s1 + $0x208] sm:$0xff]  ;;  %866 = vmatprep.subr.mxu1 %v215_v2  ;;  %796 = vmatpush2.msra.mxu0 %v86_v4 }
  0x40   :  { %v211_v7 = vld [vmem:[%s3530_s1 + $0x608] sm:$0xff]  ;;  %v82_v9 = vld [vmem:[%s3530_s1 + $0x200] sm:$0xff]  ;;  %867 = vmatpush2.msra.mxu1 %v214_v5  ;;  %797 = vmatprep.subr.mxu0 %v83_v6 }
  0x41   :  { %v210_v10 = vld [vmem:[%s3530_s1 + $0x600] sm:$0xff]  ;;  %868 = vmatprep.subr.mxu1 %v211_v7  ;;  %v335_v12 = vld [vmem:[%s3530_s1 + $0x9e8] sm:$0xff]  ;;  %798 = vmatpush2.msra.mxu0 %v82_v9 }
  0x42   :  { %799 = vmatprep.mubr.f32.mxu0 %v1926_v8  ;;  %v463_v13 = vld [vmem:[%s3530_s1 + $0xde8] sm:$0xff]  ;;  %869 = vmatpush2.msra.mxu1 %v210_v10  ;;  %v334_v14 = vld [vmem:[%s3530_s1 + $0x9e0] sm:$0xff] }
  0x43   :  { %800 = vmatmul.mubr.f32.vlgmr.msra.gmra.mxu0 %v1895_v62  ;;  %v462_v15 = vld [vmem:[%s3530_s1 + $0xde0] sm:$0xff]  ;;  %870 = vmatprep.mubr.f32.mxu1 %v1936_v11  ;;  %v331_v16 = vld [vmem:[%s3530_s1 + $0x9c8] sm:$0xff] }
  0x44   :  { %877 = vmatprep.subr.mxu0 %v335_v12  ;;  %v459_v17 = vld [vmem:[%s3530_s1 + $0xdc8] sm:$0xff]  ;;  %948 = vmatprep.subr.mxu1 %v463_v13  ;;  %v330_v18 = vld [vmem:[%s3530_s1 + $0x9c0] sm:$0xff] }
  0x45   :  { %871 = vmatmul.mubr.f32.vlgmr.msra.gmra.mxu1 %v1910_v3  ;;  %v458_v19 = vld [vmem:[%s3530_s1 + $0xdc0] sm:$0xff]  ;;  %878 = vmatpush1.msra.mxu0 %v334_v14  ;;  %v327_v20 = vld [vmem:[%s3530_s1 + $0x9a8] sm:$0xff] }
  0x46   :  { %949 = vmatpush1.msra.mxu1 %v462_v15  ;;  %v455_v21 = vld [vmem:[%s3530_s1 + $0xda8] sm:$0xff]  ;;  %879 = vmatprep.subr.mxu0 %v331_v16  ;;  %v326_v22 = vld [vmem:[%s3530_s1 + $0x9a0] sm:$0xff] }
  0x47   :  { %950 = vmatprep.subr.mxu1 %v459_v17  ;;  %v454_v23 = vld [vmem:[%s3530_s1 + $0xda0] sm:$0xff]  ;;  %880 = vmatpush1.msra.mxu0 %v330_v18  ;;  %v323_v24 = vld [vmem:[%s3530_s1 + $0x988] sm:$0xff] }
  0x48   :  { %951 = vmatpush1.msra.mxu1 %v458_v19  ;;  %v451_v25 = vld [vmem:[%s3530_s1 + $0xd88] sm:$0xff]  ;;  %881 = vmatprep.subr.mxu0 %v327_v20  ;;  %v322_v26 = vld [vmem:[%s3530_s1 + $0x980] sm:$0xff] }
  0x49   :  { %952 = vmatprep.subr.mxu1 %v455_v21  ;;  %v450_v27 = vld [vmem:[%s3530_s1 + $0xd80] sm:$0xff]  ;;  %882 = vmatpush1.msra.mxu0 %v326_v22  ;;  %v319_v28 = vld [vmem:[%s3530_s1 + $0x968] sm:$0xff] }
  0x4a   :  { %953 = vmatpush1.msra.mxu1 %v454_v23  ;;  %v447_v29 = vld [vmem:[%s3530_s1 + $0xd68] sm:$0xff]  ;;  %883 = vmatprep.subr.mxu0 %v323_v24  ;;  %v318_v30 = vld [vmem:[%s3530_s1 + $0x960] sm:$0xff] }
  0x4b   :  { %954 = vmatprep.subr.mxu1 %v451_v25  ;;  %v446_v31 = vld [vmem:[%s3530_s1 + $0xd60] sm:$0xff]  ;;  %884 = vmatpush1.msra.mxu0 %v322_v26  ;;  %v315_v32 = vld [vmem:[%s3530_s1 + $0x948] sm:$0xff] }
  0x4c   :  { %955 = vmatpush1.msra.mxu1 %v450_v27  ;;  %v443_v33 = vld [vmem:[%s3530_s1 + $0xd48] sm:$0xff]  ;;  %885 = vmatprep.subr.mxu0 %v319_v28  ;;  %v314_v34 = vld [vmem:[%s3530_s1 + $0x940] sm:$0xff] }
  0x4d   :  { %956 = vmatprep.subr.mxu1 %v447_v29  ;;  %v442_v35 = vld [vmem:[%s3530_s1 + $0xd40] sm:$0xff]  ;;  %886 = vmatpush1.msra.mxu0 %v318_v30  ;;  %v311_v36 = vld [vmem:[%s3530_s1 + $0x928] sm:$0xff] }
  0x4e   :  { %957 = vmatpush1.msra.mxu1 %v446_v31  ;;  %v439_v37 = vld [vmem:[%s3530_s1 + $0xd28] sm:$0xff]  ;;  %887 = vmatprep.subr.mxu0 %v315_v32  ;;  %v310_v38 = vld [vmem:[%s3530_s1 + $0x920] sm:$0xff] }
  0x4f   :  { %958 = vmatprep.subr.mxu1 %v443_v33  ;;  %v438_v39 = vld [vmem:[%s3530_s1 + $0xd20] sm:$0xff]  ;;  %888 = vmatpush1.msra.mxu0 %v314_v34  ;;  %v307_v40 = vld [vmem:[%s3530_s1 + $0x908] sm:$0xff] }
  0x50   :  { %959 = vmatpush1.msra.mxu1 %v442_v35  ;;  %v435_v42 = vld [vmem:[%s3530_s1 + $0xd08] sm:$0xff]  ;;  %889 = vmatprep.subr.mxu0 %v311_v36  ;;  %v306_v43 = vld [vmem:[%s3530_s1 + $0x900] sm:$0xff] }
  0x51   :  { %960 = vmatprep.subr.mxu1 %v439_v37  ;;  %v434_v44 = vld [vmem:[%s3530_s1 + $0xd00] sm:$0xff]  ;;  %890 = vmatpush1.msra.mxu0 %v310_v38  ;;  %v303_v45 = vld [vmem:[%s3530_s1 + $0x8e8] sm:$0xff] }
  0x52   :  { %961 = vmatpush1.msra.mxu1 %v438_v39  ;;  %v431_v46 = vld [vmem:[%s3530_s1 + $0xce8] sm:$0xff]  ;;  %891 = vmatprep.subr.mxu0 %v307_v40  ;;  %v302_v47 = vld [vmem:[%s3530_s1 + $0x8e0] sm:$0xff] }
  0x53   :  { %962 = vmatprep.subr.mxu1 %v435_v42  ;;  %v430_v48 = vld [vmem:[%s3530_s1 + $0xce0] sm:$0xff]  ;;  %892 = vmatpush1.msra.mxu0 %v306_v43  ;;  %v299_v49 = vld [vmem:[%s3530_s1 + $0x8c8] sm:$0xff] }
  0x54   :  { %963 = vmatpush1.msra.mxu1 %v434_v44  ;;  %v427_v50 = vld [vmem:[%s3530_s1 + $0xcc8] sm:$0xff]  ;;  %893 = vmatprep.subr.mxu0 %v303_v45  ;;  %v298_v51 = vld [vmem:[%s3530_s1 + $0x8c0] sm:$0xff] }
  0x55   :  { %964 = vmatprep.subr.mxu1 %v431_v46  ;;  %v426_v53 = vld [vmem:[%s3530_s1 + $0xcc0] sm:$0xff]  ;;  %894 = vmatpush1.msra.mxu0 %v302_v47  ;;  %v295_v54 = vld [vmem:[%s3530_s1 + $0x8a8] sm:$0xff] }
  0x56   :  { %965 = vmatpush1.msra.mxu1 %v430_v48  ;;  %v423_v55 = vld [vmem:[%s3530_s1 + $0xca8] sm:$0xff]  ;;  %895 = vmatprep.subr.mxu0 %v299_v49  ;;  %v294_v56 = vld [vmem:[%s3530_s1 + $0x8a0] sm:$0xff] }
  0x57   :  { %966 = vmatprep.subr.mxu1 %v427_v50  ;;  %v422_v57 = vld [vmem:[%s3530_s1 + $0xca0] sm:$0xff]  ;;  %896 = vmatpush1.msra.mxu0 %v298_v51  ;;  %v291_v58 = vld [vmem:[%s3530_s1 + $0x888] sm:$0xff] }
  0x58   :  { %967 = vmatpush1.msra.mxu1 %v426_v53  ;;  %v419_v59 = vld [vmem:[%s3530_s1 + $0xc88] sm:$0xff]  ;;  %897 = vmatprep.subr.mxu0 %v295_v54  ;;  %v290_v60 = vld [vmem:[%s3530_s1 + $0x880] sm:$0xff] }
  0x59   :  { %968 = vmatprep.subr.mxu1 %v423_v55  ;;  %v418_v61 = vld [vmem:[%s3530_s1 + $0xc80] sm:$0xff]  ;;  %898 = vmatpush1.msra.mxu0 %v294_v56  ;;  %v287_v63 = vld [vmem:[%s3530_s1 + $0x868] sm:$0xff] }
  0x5a   :  { %969 = vmatpush1.msra.mxu1 %v422_v57  ;;  %v415_v0 = vld [vmem:[%s3530_s1 + $0xc68] sm:$0xff]  ;;  %899 = vmatprep.subr.mxu0 %v291_v58  ;;  %v286_v1 = vld [vmem:[%s3530_s1 + $0x860] sm:$0xff] }
  0x5b   :  { %970 = vmatprep.subr.mxu1 %v419_v59  ;;  %v414_v2 = vld [vmem:[%s3530_s1 + $0xc60] sm:$0xff]  ;;  %900 = vmatpush1.msra.mxu0 %v290_v60  ;;  %v283_v4 = vld [vmem:[%s3530_s1 + $0x848] sm:$0xff] }
  0x5c   :  { %971 = vmatpush1.msra.mxu1 %v418_v61  ;;  %v411_v5 = vld [vmem:[%s3530_s1 + $0xc48] sm:$0xff]  ;;  %901 = vmatprep.subr.mxu0 %v287_v63  ;;  %v282_v6 = vld [vmem:[%s3530_s1 + $0x840] sm:$0xff] }
  0x5d   :  { %972 = vmatprep.subr.mxu1 %v415_v0  ;;  %v410_v7 = vld [vmem:[%s3530_s1 + $0xc40] sm:$0xff]  ;;  %902 = vmatpush1.msra.mxu0 %v286_v1  ;;  %v279_v9 = vld [vmem:[%s3530_s1 + $0x828] sm:$0xff] }
  0x5e   :  { %973 = vmatpush1.msra.mxu1 %v414_v2  ;;  %v407_v10 = vld [vmem:[%s3530_s1 + $0xc28] sm:$0xff]  ;;  %903 = vmatprep.subr.mxu0 %v283_v4  ;;  %v278_v12 = vld [vmem:[%s3530_s1 + $0x820] sm:$0xff] }
  0x5f   :  { %974 = vmatprep.subr.mxu1 %v411_v5  ;;  %v406_v13 = vld [vmem:[%s3530_s1 + $0xc20] sm:$0xff]  ;;  %904 = vmatpush1.msra.mxu0 %v282_v6  ;;  %v275_v14 = vld [vmem:[%s3530_s1 + $0x808] sm:$0xff] }
  0x60   :  { %975 = vmatpush1.msra.mxu1 %v410_v7  ;;  %v403_v15 = vld [vmem:[%s3530_s1 + $0xc08] sm:$0xff]  ;;  %905 = vmatprep.subr.mxu0 %v279_v9  ;;  %v274_v16 = vld [vmem:[%s3530_s1 + $0x800] sm:$0xff] }
  0x61   :  { %976 = vmatprep.subr.mxu1 %v407_v10  ;;  %v402_v17 = vld [vmem:[%s3530_s1 + $0xc00] sm:$0xff]  ;;  %906 = vmatpush1.msra.mxu0 %v278_v12  ;;  %v399_v18 = vld [vmem:[%s3530_s1 + $0xbe8] sm:$0xff] }
  0x62   :  { %977 = vmatpush1.msra.mxu1 %v406_v13  ;;  %v527_v19 = vld [vmem:[%s3530_s1 + $0xfe8] sm:$0xff]  ;;  %907 = vmatprep.subr.mxu0 %v275_v14  ;;  %v398_v20 = vld [vmem:[%s3530_s1 + $0xbe0] sm:$0xff] }
  0x63   :  { %978 = vmatprep.subr.mxu1 %v403_v15  ;;  %v526_v21 = vld [vmem:[%s3530_s1 + $0xfe0] sm:$0xff]  ;;  %908 = vmatpush1.msra.mxu0 %v274_v16  ;;  %v395_v22 = vld [vmem:[%s3530_s1 + $0xbc8] sm:$0xff] }
  0x64   :  { %979 = vmatpush1.msra.mxu1 %v402_v17  ;;  %v523_v23 = vld [vmem:[%s3530_s1 + $0xfc8] sm:$0xff]  ;;  %909 = vmatprep.subr.mxu0 %v399_v18  ;;  %v394_v24 = vld [vmem:[%s3530_s1 + $0xbc0] sm:$0xff] }
  0x65   :  { %980 = vmatprep.subr.mxu1 %v527_v19  ;;  %v522_v25 = vld [vmem:[%s3530_s1 + $0xfc0] sm:$0xff]  ;;  %910 = vmatpush2.msra.mxu0 %v398_v20  ;;  %v391_v26 = vld [vmem:[%s3530_s1 + $0xba8] sm:$0xff] }
  0x66   :  { %981 = vmatpush2.msra.mxu1 %v526_v21  ;;  %v519_v27 = vld [vmem:[%s3530_s1 + $0xfa8] sm:$0xff]  ;;  %911 = vmatprep.subr.mxu0 %v395_v22  ;;  %v390_v28 = vld [vmem:[%s3530_s1 + $0xba0] sm:$0xff] }
  0x67   :  { %982 = vmatprep.subr.mxu1 %v523_v23  ;;  %v518_v29 = vld [vmem:[%s3530_s1 + $0xfa0] sm:$0xff]  ;;  %912 = vmatpush2.msra.mxu0 %v394_v24  ;;  %v387_v30 = vld [vmem:[%s3530_s1 + $0xb88] sm:$0xff] }
  0x68   :  { %983 = vmatpush2.msra.mxu1 %v522_v25  ;;  %v515_v31 = vld [vmem:[%s3530_s1 + $0xf88] sm:$0xff]  ;;  %913 = vmatprep.subr.mxu0 %v391_v26  ;;  %v386_v32 = vld [vmem:[%s3530_s1 + $0xb80] sm:$0xff] }
  0x69   :  { %984 = vmatprep.subr.mxu1 %v519_v27  ;;  %v514_v33 = vld [vmem:[%s3530_s1 + $0xf80] sm:$0xff]  ;;  %914 = vmatpush2.msra.mxu0 %v390_v28  ;;  %v383_v34 = vld [vmem:[%s3530_s1 + $0xb68] sm:$0xff] }
  0x6a   :  { %985 = vmatpush2.msra.mxu1 %v518_v29  ;;  %v511_v35 = vld [vmem:[%s3530_s1 + $0xf68] sm:$0xff]  ;;  %915 = vmatprep.subr.mxu0 %v387_v30  ;;  %v382_v36 = vld [vmem:[%s3530_s1 + $0xb60] sm:$0xff] }
  0x6b   :  { %986 = vmatprep.subr.mxu1 %v515_v31  ;;  %v510_v37 = vld [vmem:[%s3530_s1 + $0xf60] sm:$0xff]  ;;  %916 = vmatpush2.msra.mxu0 %v386_v32  ;;  %v379_v38 = vld [vmem:[%s3530_s1 + $0xb48] sm:$0xff]  ;;  %v81_v31 = vld [vmem:[%s3530_s1 + $0x1f8] sm:$0xff] }
  0x6c   :  { %987 = vmatpush2.msra.mxu1 %v514_v33  ;;  %v507_v39 = vld [vmem:[%s3530_s1 + $0xf48] sm:$0xff]  ;;  %917 = vmatprep.subr.mxu0 %v383_v34  ;;  %v378_v40 = vld [vmem:[%s3530_s1 + $0xb40] sm:$0xff]  ;;  %v80_v33 = vld [vmem:[%s3530_s1 + $0x1f0] sm:$0xff] }
  0x6d   :  { %988 = vmatprep.subr.mxu1 %v511_v35  ;;  %v506_v42 = vld [vmem:[%s3530_s1 + $0xf40] sm:$0xff]  ;;  %918 = vmatpush2.msra.mxu0 %v382_v36  ;;  %v375_v43 = vld [vmem:[%s3530_s1 + $0xb28] sm:$0xff]  ;;  %v77_v35 = vld [vmem:[%s3530_s1 + $0x1d8] sm:$0xff] }
  0x6e   :  { %989 = vmatpush2.msra.mxu1 %v510_v37  ;;  %v503_v44 = vld [vmem:[%s3530_s1 + $0xf28] sm:$0xff]  ;;  %919 = vmatprep.subr.mxu0 %v379_v38  ;;  %v374_v45 = vld [vmem:[%s3530_s1 + $0xb20] sm:$0xff]  ;;  %v76_v37 = vld [vmem:[%s3530_s1 + $0x1d0] sm:$0xff] }
  0x6f   :  { %990 = vmatprep.subr.mxu1 %v507_v39  ;;  %v502_v46 = vld [vmem:[%s3530_s1 + $0xf20] sm:$0xff]  ;;  %920 = vmatpush2.msra.mxu0 %v378_v40  ;;  %v371_v47 = vld [vmem:[%s3530_s1 + $0xb08] sm:$0xff]  ;;  %v73_v39 = vld [vmem:[%s3530_s1 + $0x1b8] sm:$0xff] }
  0x70   :  { %991 = vmatpush2.msra.mxu1 %v506_v42  ;;  %v499_v48 = vld [vmem:[%s3530_s1 + $0xf08] sm:$0xff]  ;;  %921 = vmatprep.subr.mxu0 %v375_v43  ;;  %v370_v49 = vld [vmem:[%s3530_s1 + $0xb00] sm:$0xff]  ;;  %v72_v42 = vld [vmem:[%s3530_s1 + $0x1b0] sm:$0xff] }
  0x71   :  { %992 = vmatprep.subr.mxu1 %v503_v44  ;;  %v498_v50 = vld [vmem:[%s3530_s1 + $0xf00] sm:$0xff]  ;;  %922 = vmatpush2.msra.mxu0 %v374_v45  ;;  %v367_v51 = vld [vmem:[%s3530_s1 + $0xae8] sm:$0xff]  ;;  %v69_v44 = vld [vmem:[%s3530_s1 + $0x198] sm:$0xff] }
  0x72   :  { %993 = vmatpush2.msra.mxu1 %v502_v46  ;;  %v495_v53 = vld [vmem:[%s3530_s1 + $0xee8] sm:$0xff]  ;;  %923 = vmatprep.subr.mxu0 %v371_v47  ;;  %v366_v54 = vld [vmem:[%s3530_s1 + $0xae0] sm:$0xff]  ;;  %v68_v46 = vld [vmem:[%s3530_s1 + $0x190] sm:$0xff] }
  0x73   :  { %994 = vmatprep.subr.mxu1 %v499_v48  ;;  %v494_v55 = vld [vmem:[%s3530_s1 + $0xee0] sm:$0xff]  ;;  %924 = vmatpush2.msra.mxu0 %v370_v49  ;;  %v363_v56 = vld [vmem:[%s3530_s1 + $0xac8] sm:$0xff]  ;;  %v65_v48 = vld [vmem:[%s3530_s1 + $0x178] sm:$0xff] }
  0x74   :  { %995 = vmatpush2.msra.mxu1 %v498_v50  ;;  %v491_v57 = vld [vmem:[%s3530_s1 + $0xec8] sm:$0xff]  ;;  %925 = vmatprep.subr.mxu0 %v367_v51  ;;  %v362_v58 = vld [vmem:[%s3530_s1 + $0xac0] sm:$0xff]  ;;  %v64_v50 = vld [vmem:[%s3530_s1 + $0x170] sm:$0xff] }
  0x75   :  { %996 = vmatprep.subr.mxu1 %v495_v53  ;;  %v490_v59 = vld [vmem:[%s3530_s1 + $0xec0] sm:$0xff]  ;;  %926 = vmatpush2.msra.mxu0 %v366_v54  ;;  %v359_v60 = vld [vmem:[%s3530_s1 + $0xaa8] sm:$0xff]  ;;  %v61_v53 = vld [vmem:[%s3530_s1 + $0x158] sm:$0xff] }
  0x76   :  { %997 = vmatpush2.msra.mxu1 %v494_v55  ;;  %v487_v61 = vld [vmem:[%s3530_s1 + $0xea8] sm:$0xff]  ;;  %927 = vmatprep.subr.mxu0 %v363_v56  ;;  %v358_v63 = vld [vmem:[%s3530_s1 + $0xaa0] sm:$0xff]  ;;  %v60_v55 = vld [vmem:[%s3530_s1 + $0x150] sm:$0xff] }
  0x77   :  { %998 = vmatprep.subr.mxu1 %v491_v57  ;;  %v486_v0 = vld [vmem:[%s3530_s1 + $0xea0] sm:$0xff]  ;;  %v16_v1 = vld [vmem:[%s3529_s0 + $0x8] sm:$0xff]  ;;  %928 = vmatpush2.msra.mxu0 %v362_v58  ;;  %v57_v57 = vld [vmem:[%s3530_s1 + $0x138] sm:$0xff] }
  0x78   :  { %999 = vmatpush2.msra.mxu1 %v490_v59  ;;  %v355_v2 = vld [vmem:[%s3530_s1 + $0xa88] sm:$0xff]  ;;  %929 = vmatprep.subr.mxu0 %v359_v60  ;;  %v354_v5 = vld [vmem:[%s3530_s1 + $0xa80] sm:$0xff]  ;;  %v700_v10 = vcombine.high %v16_v1, %v16_v1  ;;  %v2300_v16 = vrot.slane %v16_v1, %v1868_v52  ;;  %v56_v59 = vld [vmem:[%s3530_s1 + $0x130] sm:$0xff] }
  0x79   :  { %v483_v4 = vld [vmem:[%s3530_s1 + $0xe88] sm:$0xff]  ;;  %1000 = vmatprep.subr.mxu1 %v487_v61  ;;  %v482_v6 = vld [vmem:[%s3530_s1 + $0xe80] sm:$0xff]  ;;  %930 = vmatpush2.msra.mxu0 %v358_v63  ;;  %v53_v61 = vld [vmem:[%s3530_s1 + $0x118] sm:$0xff] }
  0x7a   :  { %1001 = vmatpush2.msra.mxu1 %v486_v0  ;;  %v351_v7 = vld [vmem:[%s3530_s1 + $0xa68] sm:$0xff]  ;;  %931 = vmatprep.subr.mxu0 %v355_v2  ;;  %v350_v12 = vld [vmem:[%s3530_s1 + $0xa60] sm:$0xff]  ;;  %v2315_v21 = vrot.slane %v700_v10, %v1868_v52  ;;  %v2331_v26 = vcombine.high %v2300_v16, %v2300_v16  ;;  %v52_v0 = vld [vmem:[%s3530_s1 + $0x110] sm:$0xff] }
  0x7b   :  { %v479_v9 = vld [vmem:[%s3530_s1 + $0xe68] sm:$0xff]  ;;  %1002 = vmatprep.subr.mxu1 %v483_v4  ;;  %v478_v13 = vld [vmem:[%s3530_s1 + $0xe60] sm:$0xff]  ;;  %932 = vmatpush2.msra.mxu0 %v354_v5  ;;  %v49_v2 = vld [vmem:[%s3530_s1 + $0xf8] sm:$0xff] }
  0x7c   :  { %1003 = vmatpush2.msra.mxu1 %v482_v6  ;;  %v347_v14 = vld [vmem:[%s3530_s1 + $0xa48] sm:$0xff]  ;;  %933 = vmatprep.subr.mxu0 %v351_v7  ;;  %v346_v17 = vld [vmem:[%s3530_s1 + $0xa40] sm:$0xff]  ;;  %v2341_v29 = vcombine.high %v2315_v21, %v2315_v21  ;;  %v48_v5 = vld [vmem:[%s3530_s1 + $0xf0] sm:$0xff] }
  0x7d   :  { %v475_v15 = vld [vmem:[%s3530_s1 + $0xe48] sm:$0xff]  ;;  %1004 = vmatprep.subr.mxu1 %v479_v9  ;;  %v474_v18 = vld [vmem:[%s3530_s1 + $0xe40] sm:$0xff]  ;;  %934 = vmatpush2.msra.mxu0 %v350_v12  ;;  %v45_v7 = vld [vmem:[%s3530_s1 + $0xd8] sm:$0xff] }
  0x7e   :  { %1005 = vmatpush2.msra.mxu1 %v478_v13  ;;  %v343_v19 = vld [vmem:[%s3530_s1 + $0xa28] sm:$0xff]  ;;  %935 = vmatprep.subr.mxu0 %v347_v14  ;;  %v342_v22 = vld [vmem:[%s3530_s1 + $0xa20] sm:$0xff]  ;;  %v44_v10 = vld [vmem:[%s3530_s1 + $0xd0] sm:$0xff] }
  0x7f   :  { %v471_v20 = vld [vmem:[%s3530_s1 + $0xe28] sm:$0xff]  ;;  %1006 = vmatprep.subr.mxu1 %v475_v15  ;;  %v470_v23 = vld [vmem:[%s3530_s1 + $0xe20] sm:$0xff]  ;;  %936 = vmatpush2.msra.mxu0 %v346_v17  ;;  %v41_v13 = vld [vmem:[%s3530_s1 + $0xb8] sm:$0xff] }
  0x80   :  { %1007 = vmatpush2.msra.mxu1 %v474_v18  ;;  %v339_v24 = vld [vmem:[%s3530_s1 + $0xa08] sm:$0xff]  ;;  %937 = vmatprep.subr.mxu0 %v343_v19  ;;  %v338_v27 = vld [vmem:[%s3530_s1 + $0xa00] sm:$0xff]  ;;  %v40_v15 = vld [vmem:[%s3530_s1 + $0xb0] sm:$0xff] }
  0x81   :  { %v467_v25 = vld [vmem:[%s3530_s1 + $0xe08] sm:$0xff]  ;;  %1008 = vmatprep.subr.mxu1 %v471_v20  ;;  %938 = vmatpush2.msra.mxu0 %v342_v22  ;;  %v466_v28 = vld [vmem:[%s3530_s1 + $0xe00] sm:$0xff]  ;;  %v37_v18 = vld [vmem:[%s3530_s1 + $0x98] sm:$0xff] }
  0x82   :  { %1009 = vmatpush2.msra.mxu1 %v470_v23  ;;  %939 = vmatprep.subr.mxu0 %v339_v24  ;;  %v591_v30 = vld [vmem:[%s3530_s1 + $0x11e8] sm:$0xff]  ;;  %v590_v32 = vld [vmem:[%s3530_s1 + $0x11e0] sm:$0xff]  ;;  %v36_v20 = vld [vmem:[%s3530_s1 + $0x90] sm:$0xff] }
  0x83   :  { %1010 = vmatprep.subr.mxu1 %v467_v25  ;;  %940 = vmatpush2.msra.mxu0 %v338_v27  ;;  %v587_v34 = vld [vmem:[%s3530_s1 + $0x11c8] sm:$0xff]  ;;  %v586_v36 = vld [vmem:[%s3530_s1 + $0x11c0] sm:$0xff]  ;;  %v33_v23 = vld [vmem:[%s3530_s1 + $0x78] sm:$0xff] }
  0x84   :  { %941 = vmatprep.mubr.f32.mxu0 %v2331_v26  ;;  %1011 = vmatpush2.msra.mxu1 %v466_v28  ;;  %v583_v38 = vld [vmem:[%s3530_s1 + $0x11a8] sm:$0xff]  ;;  %v582_v40 = vld [vmem:[%s3530_s1 + $0x11a0] sm:$0xff]  ;;  %v32_v25 = vld [vmem:[%s3530_s1 + $0x70] sm:$0xff] }
  0x85   :  { %942 = vmatmul.mubr.f32.vlgmr.msra.gmra.mxu0 %v2300_v16  ;;  %1012 = vmatprep.mubr.f32.mxu1 %v2341_v29  ;;  %v579_v43 = vld [vmem:[%s3530_s1 + $0x1188] sm:$0xff]  ;;  %v578_v45 = vld [vmem:[%s3530_s1 + $0x1180] sm:$0xff]  ;;  %v29_v28 = vld [vmem:[%s3530_s1 + $0x58] sm:$0xff] }
  0x86   :  { %1019 = vmatprep.subr.mxu0 %v591_v30  ;;  %1090 = vmatprep.subr.mxu1 %v81_v31  ;;  %v575_v47 = vld [vmem:[%s3530_s1 + $0x1168] sm:$0xff]  ;;  %v574_v49 = vld [vmem:[%s3530_s1 + $0x1160] sm:$0xff]  ;;  %v28_v31 = vld [vmem:[%s3530_s1 + $0x50] sm:$0xff] }
  0x87   :  { %1013 = vmatmul.mubr.f32.vlgmr.msra.gmra.mxu1 %v2315_v21  ;;  %1020 = vmatpush1.msra.mxu0 %v590_v32  ;;  %v571_v51 = vld [vmem:[%s3530_s1 + $0x1148] sm:$0xff]  ;;  %v570_v54 = vld [vmem:[%s3530_s1 + $0x1140] sm:$0xff] }
  0x88   :  { %1091 = vmatpush1.msra.mxu1 %v80_v33  ;;  %1021 = vmatprep.subr.mxu0 %v587_v34  ;;  %v567_v56 = vld [vmem:[%s3530_s1 + $0x1128] sm:$0xff]  ;;  %v566_v58 = vld [vmem:[%s3530_s1 + $0x1120] sm:$0xff]  ;;  %v25_v33 = vld [vmem:[%s3530_s1 + $0x38] sm:$0xff] }
  0x89   :  { %1092 = vmatprep.subr.mxu1 %v77_v35  ;;  %1022 = vmatpush1.msra.mxu0 %v586_v36  ;;  %v563_v60 = vld [vmem:[%s3530_s1 + $0x1108] sm:$0xff]  ;;  %v562_v63 = vld [vmem:[%s3530_s1 + $0x1100] sm:$0xff]  ;;  %v24_v35 = vld [vmem:[%s3530_s1 + $0x30] sm:$0xff] }
  0x8a   :  { %1093 = vmatpush1.msra.mxu1 %v76_v37  ;;  %1023 = vmatprep.subr.mxu0 %v583_v38  ;;  %v559_v1 = vld [vmem:[%s3530_s1 + $0x10e8] sm:$0xff]  ;;  %v558_v4 = vld [vmem:[%s3530_s1 + $0x10e0] sm:$0xff]  ;;  %v21_v37 = vld [vmem:[%s3530_s1 + $0x18] sm:$0xff] }
  0x8b   :  { %1094 = vmatprep.subr.mxu1 %v73_v39  ;;  %1024 = vmatpush1.msra.mxu0 %v582_v40  ;;  %v555_v6 = vld [vmem:[%s3530_s1 + $0x10c8] sm:$0xff]  ;;  %v554_v9 = vld [vmem:[%s3530_s1 + $0x10c0] sm:$0xff]  ;;  %v20_v39 = vld [vmem:[%s3530_s1 + $0x10] sm:$0xff] }
  0x8c   :  { %1095 = vmatpush1.msra.mxu1 %v72_v42  ;;  %1025 = vmatprep.subr.mxu0 %v579_v43  ;;  %v551_v12 = vld [vmem:[%s3530_s1 + $0x10a8] sm:$0xff]  ;;  %v550_v14 = vld [vmem:[%s3530_s1 + $0x10a0] sm:$0xff]  ;;  %v145_v42 = vld [vmem:[%s3530_s1 + $0x3f8] sm:$0xff] }
  0x8d   :  { %1096 = vmatprep.subr.mxu1 %v69_v44  ;;  %1026 = vmatpush1.msra.mxu0 %v578_v45  ;;  %v547_v17 = vld [vmem:[%s3530_s1 + $0x1088] sm:$0xff]  ;;  %v546_v19 = vld [vmem:[%s3530_s1 + $0x1080] sm:$0xff]  ;;  %v144_v44 = vld [vmem:[%s3530_s1 + $0x3f0] sm:$0xff] }
  0x8e   :  { %1097 = vmatpush1.msra.mxu1 %v68_v46  ;;  %1027 = vmatprep.subr.mxu0 %v575_v47  ;;  %v543_v22 = vld [vmem:[%s3530_s1 + $0x1068] sm:$0xff]  ;;  %v542_v24 = vld [vmem:[%s3530_s1 + $0x1060] sm:$0xff]  ;;  %v141_v46 = vld [vmem:[%s3530_s1 + $0x3d8] sm:$0xff] }
  0x8f   :  { %1098 = vmatprep.subr.mxu1 %v65_v48  ;;  %1028 = vmatpush1.msra.mxu0 %v574_v49  ;;  %v539_v27 = vld [vmem:[%s3530_s1 + $0x1048] sm:$0xff]  ;;  %v538_v30 = vld [vmem:[%s3530_s1 + $0x1040] sm:$0xff]  ;;  %v140_v48 = vld [vmem:[%s3530_s1 + $0x3d0] sm:$0xff] }
  0x90   :  { %1099 = vmatpush1.msra.mxu1 %v64_v50  ;;  %1029 = vmatprep.subr.mxu0 %v571_v51  ;;  %v535_v32 = vld [vmem:[%s3530_s1 + $0x1028] sm:$0xff]  ;;  %v534_v34 = vld [vmem:[%s3530_s1 + $0x1020] sm:$0xff]  ;;  %v137_v50 = vld [vmem:[%s3530_s1 + $0x3b8] sm:$0xff] }
  0x91   :  { %1100 = vmatprep.subr.mxu1 %v61_v53  ;;  %1030 = vmatpush1.msra.mxu0 %v570_v54  ;;  %v531_v36 = vld [vmem:[%s3530_s1 + $0x1008] sm:$0xff]  ;;  %v530_v38 = vld [vmem:[%s3530_s1 + $0x1000] sm:$0xff]  ;;  %v136_v53 = vld [vmem:[%s3530_s1 + $0x3b0] sm:$0xff] }
  0x92   :  { %1101 = vmatpush1.msra.mxu1 %v60_v55  ;;  %1031 = vmatprep.subr.mxu0 %v567_v56  ;;  %v655_v40 = vld [vmem:[%s3530_s1 + $0x13e8] sm:$0xff]  ;;  %v654_v43 = vld [vmem:[%s3530_s1 + $0x13e0] sm:$0xff]  ;;  %v133_v55 = vld [vmem:[%s3530_s1 + $0x398] sm:$0xff] }
  0x93   :  { %1102 = vmatprep.subr.mxu1 %v57_v57  ;;  %1032 = vmatpush1.msra.mxu0 %v566_v58  ;;  %v651_v45 = vld [vmem:[%s3530_s1 + $0x13c8] sm:$0xff]  ;;  %v650_v47 = vld [vmem:[%s3530_s1 + $0x13c0] sm:$0xff]  ;;  %v132_v57 = vld [vmem:[%s3530_s1 + $0x390] sm:$0xff] }
  0x94   :  { %1103 = vmatpush1.msra.mxu1 %v56_v59  ;;  %1033 = vmatprep.subr.mxu0 %v563_v60  ;;  %v647_v49 = vld [vmem:[%s3530_s1 + $0x13a8] sm:$0xff]  ;;  %v646_v51 = vld [vmem:[%s3530_s1 + $0x13a0] sm:$0xff]  ;;  %v129_v59 = vld [vmem:[%s3530_s1 + $0x378] sm:$0xff] }
  0x95   :  { %1104 = vmatprep.subr.mxu1 %v53_v61  ;;  %1034 = vmatpush1.msra.mxu0 %v562_v63  ;;  %v643_v54 = vld [vmem:[%s3530_s1 + $0x1388] sm:$0xff]  ;;  %v642_v56 = vld [vmem:[%s3530_s1 + $0x1380] sm:$0xff]  ;;  %v128_v61 = vld [vmem:[%s3530_s1 + $0x370] sm:$0xff] }
  0x96   :  { %1105 = vmatpush1.msra.mxu1 %v52_v0  ;;  %1035 = vmatprep.subr.mxu0 %v559_v1  ;;  %v639_v58 = vld [vmem:[%s3530_s1 + $0x1368] sm:$0xff]  ;;  %v638_v60 = vld [vmem:[%s3530_s1 + $0x1360] sm:$0xff]  ;;  %v125_v0 = vld [vmem:[%s3530_s1 + $0x358] sm:$0xff] }
  0x97   :  { %1106 = vmatprep.subr.mxu1 %v49_v2  ;;  %1036 = vmatpush1.msra.mxu0 %v558_v4  ;;  %v635_v63 = vld [vmem:[%s3530_s1 + $0x1348] sm:$0xff]  ;;  %v634_v1 = vld [vmem:[%s3530_s1 + $0x1340] sm:$0xff]  ;;  %v124_v2 = vld [vmem:[%s3530_s1 + $0x350] sm:$0xff] }
  0x98   :  { %1107 = vmatpush1.msra.mxu1 %v48_v5  ;;  %1037 = vmatprep.subr.mxu0 %v555_v6  ;;  %v631_v4 = vld [vmem:[%s3530_s1 + $0x1328] sm:$0xff]  ;;  %v121_v5 = vld [vmem:[%s3530_s1 + $0x338] sm:$0xff]  ;;  %v630_v6 = vld [vmem:[%s3530_s1 + $0x1320] sm:$0xff] }
  0x99   :  { %1108 = vmatprep.subr.mxu1 %v45_v7  ;;  %1038 = vmatpush1.msra.mxu0 %v554_v9  ;;  %v120_v7 = vld [vmem:[%s3530_s1 + $0x330] sm:$0xff]  ;;  %v627_v9 = vld [vmem:[%s3530_s1 + $0x1308] sm:$0xff] }
  0x9a   :  { %1109 = vmatpush1.msra.mxu1 %v44_v10  ;;  %1039 = vmatprep.subr.mxu0 %v551_v12  ;;  %v117_v10 = vld [vmem:[%s3530_s1 + $0x318] sm:$0xff]  ;;  %v626_v12 = vld [vmem:[%s3530_s1 + $0x1300] sm:$0xff] }
  0x9b   :  { %1110 = vmatprep.subr.mxu1 %v41_v13  ;;  %1040 = vmatpush1.msra.mxu0 %v550_v14  ;;  %v116_v13 = vld [vmem:[%s3530_s1 + $0x310] sm:$0xff]  ;;  %v623_v14 = vld [vmem:[%s3530_s1 + $0x12e8] sm:$0xff] }
  0x9c   :  { %1111 = vmatpush1.msra.mxu1 %v40_v15  ;;  %1041 = vmatprep.subr.mxu0 %v547_v17  ;;  %v113_v15 = vld [vmem:[%s3530_s1 + $0x2f8] sm:$0xff]  ;;  %v622_v17 = vld [vmem:[%s3530_s1 + $0x12e0] sm:$0xff] }
  0x9d   :  { %1112 = vmatprep.subr.mxu1 %v37_v18  ;;  %1042 = vmatpush1.msra.mxu0 %v546_v19  ;;  %v112_v18 = vld [vmem:[%s3530_s1 + $0x2f0] sm:$0xff]  ;;  %v619_v19 = vld [vmem:[%s3530_s1 + $0x12c8] sm:$0xff] }
  0x9e   :  { %1113 = vmatpush1.msra.mxu1 %v36_v20  ;;  %1043 = vmatprep.subr.mxu0 %v543_v22  ;;  %v109_v20 = vld [vmem:[%s3530_s1 + $0x2d8] sm:$0xff]  ;;  %v618_v22 = vld [vmem:[%s3530_s1 + $0x12c0] sm:$0xff] }
  0x9f   :  { %1114 = vmatprep.subr.mxu1 %v33_v23  ;;  %1044 = vmatpush1.msra.mxu0 %v542_v24  ;;  %v108_v23 = vld [vmem:[%s3530_s1 + $0x2d0] sm:$0xff]  ;;  %v615_v24 = vld [vmem:[%s3530_s1 + $0x12a8] sm:$0xff] }
  0xa0   :  { %1115 = vmatpush1.msra.mxu1 %v32_v25  ;;  %1045 = vmatprep.subr.mxu0 %v539_v27  ;;  %v105_v25 = vld [vmem:[%s3530_s1 + $0x2b8] sm:$0xff]  ;;  %v614_v27 = vld [vmem:[%s3530_s1 + $0x12a0] sm:$0xff] }
  0xa1   :  { %1116 = vmatprep.subr.mxu1 %v29_v28  ;;  %1046 = vmatpush1.msra.mxu0 %v538_v30  ;;  %v104_v28 = vld [vmem:[%s3530_s1 + $0x2b0] sm:$0xff]  ;;  %v611_v30 = vld [vmem:[%s3530_s1 + $0x1288] sm:$0xff] }
  0xa2   :  { %1117 = vmatpush1.msra.mxu1 %v28_v31  ;;  %1047 = vmatprep.subr.mxu0 %v535_v32  ;;  %v101_v31 = vld [vmem:[%s3530_s1 + $0x298] sm:$0xff]  ;;  %v610_v32 = vld [vmem:[%s3530_s1 + $0x1280] sm:$0xff] }
  0xa3   :  { %1118 = vmatprep.subr.mxu1 %v25_v33  ;;  %1048 = vmatpush1.msra.mxu0 %v534_v34  ;;  %v100_v33 = vld [vmem:[%s3530_s1 + $0x290] sm:$0xff]  ;;  %v607_v34 = vld [vmem:[%s3530_s1 + $0x1268] sm:$0xff] }
  0xa4   :  { %1119 = vmatpush1.msra.mxu1 %v24_v35  ;;  %1049 = vmatprep.subr.mxu0 %v531_v36  ;;  %v97_v35 = vld [vmem:[%s3530_s1 + $0x278] sm:$0xff]  ;;  %v606_v36 = vld [vmem:[%s3530_s1 + $0x1260] sm:$0xff] }
  0xa5   :  { %1120 = vmatprep.subr.mxu1 %v21_v37  ;;  %1050 = vmatpush1.msra.mxu0 %v530_v38  ;;  %v96_v37 = vld [vmem:[%s3530_s1 + $0x270] sm:$0xff]  ;;  %v603_v38 = vld [vmem:[%s3530_s1 + $0x1248] sm:$0xff] }
  0xa6   :  { %1121 = vmatpush1.msra.mxu1 %v20_v39  ;;  %1051 = vmatprep.subr.mxu0 %v655_v40  ;;  %v93_v39 = vld [vmem:[%s3530_s1 + $0x258] sm:$0xff]  ;;  %v602_v40 = vld [vmem:[%s3530_s1 + $0x1240] sm:$0xff] }
  0xa7   :  { %1122 = vmatprep.subr.mxu1 %v145_v42  ;;  %1052 = vmatpush2.msra.mxu0 %v654_v43  ;;  %v92_v42 = vld [vmem:[%s3530_s1 + $0x250] sm:$0xff] }
  0xa8   :  { %1123 = vmatpush2.msra.mxu1 %v144_v44  ;;  %1053 = vmatprep.subr.mxu0 %v651_v45  ;;  %v1482_v43 = vld.sshfl [vmem:[%s3529_s0 + $0x10] sm:$0x33 pattern:$0x76325410]  ;;  %v599_v44 = vld [vmem:[%s3530_s1 + $0x1228] sm:$0xff]  ;;  %v89_v45 = vld [vmem:[%s3530_s1 + $0x238] sm:$0xff] }
  0xa9   :  { %1124 = vmatprep.subr.mxu1 %v141_v46  ;;  %1054 = vmatpush2.msra.mxu0 %v650_v47  ;;  %v598_v46 = vld [vmem:[%s3530_s1 + $0x1220] sm:$0xff]  ;;  %v88_v47 = vld [vmem:[%s3530_s1 + $0x230] sm:$0xff] }
  0xaa   :  { %1125 = vmatpush2.msra.mxu1 %v140_v48  ;;  %1055 = vmatprep.subr.mxu0 %v647_v49  ;;  %v595_v48 = vld [vmem:[%s3530_s1 + $0x1208] sm:$0xff]  ;;  %v85_v49 = vld [vmem:[%s3530_s1 + $0x218] sm:$0xff] }
  0xab   :  { %1126 = vmatprep.subr.mxu1 %v137_v50  ;;  %1056 = vmatpush2.msra.mxu0 %v646_v51  ;;  %v2728_v50 = vcombine.high %v1482_v43, %v1482_v43  ;;  %v594_v51 = vld [vmem:[%s3530_s1 + $0x1200] sm:$0xff] }
  0xac   :  { %1127 = vmatpush2.msra.mxu1 %v136_v53  ;;  %1057 = vmatprep.subr.mxu0 %v643_v54  ;;  %v84_v53 = vld [vmem:[%s3530_s1 + $0x210] sm:$0xff]  ;;  %v209_v54 = vld [vmem:[%s3530_s1 + $0x5f8] sm:$0xff] }
  0xad   :  { %1128 = vmatprep.subr.mxu1 %v133_v55  ;;  %1058 = vmatpush2.msra.mxu0 %v642_v56  ;;  %v337_v55 = vld [vmem:[%s3530_s1 + $0x9f8] sm:$0xff]  ;;  %v208_v56 = vld [vmem:[%s3530_s1 + $0x5f0] sm:$0xff] }
  0xae   :  { %1129 = vmatpush2.msra.mxu1 %v132_v57  ;;  %1059 = vmatprep.subr.mxu0 %v639_v58  ;;  %v336_v57 = vld [vmem:[%s3530_s1 + $0x9f0] sm:$0xff]  ;;  %v205_v58 = vld [vmem:[%s3530_s1 + $0x5d8] sm:$0xff] }
  0xaf   :  { %1130 = vmatprep.subr.mxu1 %v129_v59  ;;  %1060 = vmatpush2.msra.mxu0 %v638_v60  ;;  %v333_v59 = vld [vmem:[%s3530_s1 + $0x9d8] sm:$0xff]  ;;  %v204_v60 = vld [vmem:[%s3530_s1 + $0x5d0] sm:$0xff] }
  0xb0   :  { %1131 = vmatpush2.msra.mxu1 %v128_v61  ;;  %1061 = vmatprep.subr.mxu0 %v635_v63  ;;  %v201_v61 = vld [vmem:[%s3530_s1 + $0x5b8] sm:$0xff] }
  0xb1   :  { %1132 = vmatprep.subr.mxu1 %v125_v0  ;;  %1062 = vmatpush2.msra.mxu0 %v634_v1  ;;  %v329_v63 = vld [vmem:[%s3530_s1 + $0x9b8] sm:$0xff]  ;;  %v328_v0 = vld [vmem:[%s3530_s1 + $0x9b0] sm:$0xff] }
  0xb2   :  { %1133 = vmatpush2.msra.mxu1 %v124_v2  ;;  %1063 = vmatprep.subr.mxu0 %v631_v4  ;;  %v197_v1 = vld [vmem:[%s3530_s1 + $0x598] sm:$0xff]  ;;  %v196_v4 = vld [vmem:[%s3530_s1 + $0x590] sm:$0xff] }
  0xb3   :  { %1134 = vmatprep.subr.mxu1 %v121_v5  ;;  %1064 = vmatpush2.msra.mxu0 %v630_v6  ;;  %v325_v2 = vld [vmem:[%s3530_s1 + $0x998] sm:$0xff]  ;;  %v324_v5 = vld [vmem:[%s3530_s1 + $0x990] sm:$0xff] }
  0xb4   :  { %1135 = vmatpush2.msra.mxu1 %v120_v7  ;;  %1065 = vmatprep.subr.mxu0 %v627_v9  ;;  %v193_v6 = vld [vmem:[%s3530_s1 + $0x578] sm:$0xff]  ;;  %v192_v9 = vld [vmem:[%s3530_s1 + $0x570] sm:$0xff] }
  0xb5   :  { %1136 = vmatprep.subr.mxu1 %v117_v10  ;;  %1066 = vmatpush2.msra.mxu0 %v626_v12  ;;  %v321_v7 = vld [vmem:[%s3530_s1 + $0x978] sm:$0xff]  ;;  %v320_v10 = vld [vmem:[%s3530_s1 + $0x970] sm:$0xff] }
  0xb6   :  { %1137 = vmatpush2.msra.mxu1 %v116_v13  ;;  %1067 = vmatprep.subr.mxu0 %v623_v14  ;;  %v189_v12 = vld [vmem:[%s3530_s1 + $0x558] sm:$0xff]  ;;  %v188_v14 = vld [vmem:[%s3530_s1 + $0x550] sm:$0xff] }
  0xb7   :  { %1138 = vmatprep.subr.mxu1 %v113_v15  ;;  %1068 = vmatpush2.msra.mxu0 %v622_v17  ;;  %v317_v13 = vld [vmem:[%s3530_s1 + $0x958] sm:$0xff]  ;;  %v316_v15 = vld [vmem:[%s3530_s1 + $0x950] sm:$0xff] }
  0xb8   :  { %1139 = vmatpush2.msra.mxu1 %v112_v18  ;;  %1069 = vmatprep.subr.mxu0 %v619_v19  ;;  %v185_v17 = vld [vmem:[%s3530_s1 + $0x538] sm:$0xff]  ;;  %v184_v19 = vld [vmem:[%s3530_s1 + $0x530] sm:$0xff] }
  0xb9   :  { %1140 = vmatprep.subr.mxu1 %v109_v20  ;;  %1070 = vmatpush2.msra.mxu0 %v618_v22  ;;  %v313_v18 = vld [vmem:[%s3530_s1 + $0x938] sm:$0xff]  ;;  %v312_v20 = vld [vmem:[%s3530_s1 + $0x930] sm:$0xff] }
  0xba   :  { %1141 = vmatpush2.msra.mxu1 %v108_v23  ;;  %1071 = vmatprep.subr.mxu0 %v615_v24  ;;  %v181_v22 = vld [vmem:[%s3530_s1 + $0x518] sm:$0xff]  ;;  %v180_v24 = vld [vmem:[%s3530_s1 + $0x510] sm:$0xff] }
  0xbb   :  { %1142 = vmatprep.subr.mxu1 %v105_v25  ;;  %1072 = vmatpush2.msra.mxu0 %v614_v27  ;;  %v309_v23 = vld [vmem:[%s3530_s1 + $0x918] sm:$0xff]  ;;  %v308_v25 = vld [vmem:[%s3530_s1 + $0x910] sm:$0xff] }
  0xbc   :  { %1143 = vmatpush2.msra.mxu1 %v104_v28  ;;  %1073 = vmatprep.subr.mxu0 %v611_v30  ;;  %v177_v27 = vld [vmem:[%s3530_s1 + $0x4f8] sm:$0xff]  ;;  %v176_v30 = vld [vmem:[%s3530_s1 + $0x4f0] sm:$0xff] }
  0xbd   :  { %1144 = vmatprep.subr.mxu1 %v101_v31  ;;  %1074 = vmatpush2.msra.mxu0 %v610_v32  ;;  %v305_v28 = vld [vmem:[%s3530_s1 + $0x8f8] sm:$0xff]  ;;  %v304_v31 = vld [vmem:[%s3530_s1 + $0x8f0] sm:$0xff] }
  0xbe   :  { %1145 = vmatpush2.msra.mxu1 %v100_v33  ;;  %1075 = vmatprep.subr.mxu0 %v607_v34  ;;  %v173_v32 = vld [vmem:[%s3530_s1 + $0x4d8] sm:$0xff] }
  0xbf   :  { %1146 = vmatprep.subr.mxu1 %v97_v35  ;;  %1076 = vmatpush2.msra.mxu0 %v606_v36  ;;  %v301_v33 = vld [vmem:[%s3530_s1 + $0x8d8] sm:$0xff] }
  0xc0   :  { %1147 = vmatpush2.msra.mxu1 %v96_v37  ;;  %1077 = vmatprep.subr.mxu0 %v603_v38 }
  0xc1   :  { %1148 = vmatprep.subr.mxu1 %v93_v39  ;;  %1078 = vmatpush2.msra.mxu0 %v602_v40 }
  0xc2   :  { %1149 = vmatpush2.msra.mxu1 %v92_v42  ;;  %1079 = vmatprep.subr.mxu0 %v599_v44 }
  0xc3   :  { %1150 = vmatprep.subr.mxu1 %v89_v45  ;;  %1080 = vmatpush2.msra.mxu0 %v598_v46 }
  0xc4   :  { %1151 = vmatpush2.msra.mxu1 %v88_v47  ;;  %1081 = vmatprep.subr.mxu0 %v595_v48 }
  0xc5   :  { %1152 = vmatprep.subr.mxu1 %v85_v49  ;;  %1082 = vmatpush2.msra.mxu0 %v594_v51 }
  0xc6   :  { %1083 = vmatprep.mubr.f32.mxu0 %v2728_v50  ;;  %1153 = vmatpush2.msra.mxu1 %v84_v53 }
  0xc7   :  { %1084 = vmatmul.mubr.f32.vlgmr.msra.gmra.mxu0 %v1482_v43  ;;  %1154 = vmatprep.mubr.f32.mxu1 %v1926_v8  ;;  %v332_v8 = vld [vmem:[%s3530_s1 + $0x9d0] sm:$0xff] }
  0xc8   :  { %1161 = vmatprep.subr.mxu0 %v209_v54  ;;  %1232 = vmatprep.subr.mxu1 %v337_v55 }
  0xc9   :  { %1155 = vmatmul.mubr.f32.vlgmr.msra.gmra.mxu1 %v1895_v62  ;;  %1162 = vmatpush1.msra.mxu0 %v208_v56  ;;  %v200_v62 = vld [vmem:[%s3530_s1 + $0x5b0] sm:$0xff] }
  0xca   :  { %1233 = vmatpush1.msra.mxu1 %v336_v57  ;;  %1163 = vmatprep.subr.mxu0 %v205_v58 }
  0xcb   :  { %1234 = vmatprep.subr.mxu1 %v333_v59  ;;  %1164 = vmatpush1.msra.mxu0 %v204_v60 }
  0xcc   :  { %1235 = vmatpush1.msra.mxu1 %v332_v8  ;;  %1165 = vmatprep.subr.mxu0 %v201_v61 }
  0xcd   :  { %1236 = vmatprep.subr.mxu1 %v329_v63  ;;  %1166 = vmatpush1.msra.mxu0 %v200_v62 }
  0xce   :  { %1237 = vmatpush1.msra.mxu1 %v328_v0  ;;  %1167 = vmatprep.subr.mxu0 %v197_v1 }
  0xcf   :  { %1238 = vmatprep.subr.mxu1 %v325_v2  ;;  %1168 = vmatpush1.msra.mxu0 %v196_v4 }
  0xd0   :  { %1239 = vmatpush1.msra.mxu1 %v324_v5  ;;  %1169 = vmatprep.subr.mxu0 %v193_v6 }
  0xd1   :  { %1240 = vmatprep.subr.mxu1 %v321_v7  ;;  %1170 = vmatpush1.msra.mxu0 %v192_v9 }
  0xd2   :  { %1241 = vmatpush1.msra.mxu1 %v320_v10  ;;  %1171 = vmatprep.subr.mxu0 %v189_v12 }
  0xd3   :  { %1242 = vmatprep.subr.mxu1 %v317_v13  ;;  %1172 = vmatpush1.msra.mxu0 %v188_v14 }
  0xd4   :  { %1243 = vmatpush1.msra.mxu1 %v316_v15  ;;  %1173 = vmatprep.subr.mxu0 %v185_v17 }
  0xd5   :  { %1244 = vmatprep.subr.mxu1 %v313_v18  ;;  %1174 = vmatpush1.msra.mxu0 %v184_v19 }
  0xd6   :  { %1245 = vmatpush1.msra.mxu1 %v312_v20  ;;  %1175 = vmatprep.subr.mxu0 %v181_v22 }
  0xd7   :  { %1246 = vmatprep.subr.mxu1 %v309_v23  ;;  %1176 = vmatpush1.msra.mxu0 %v180_v24 }
  0xd8   :  { %1247 = vmatpush1.msra.mxu1 %v308_v25 }
  0xd9   :  { %8 = vsyncpa [#allocation3], 0  ;;  %1177 = vmatprep.subr.mxu0 %v177_v27  ;;  %1248 = vmatprep.subr.mxu1 %v305_v28  ;;  %v172_v34 = vld [vmem:[%s3530_s1 + $0x4d0] sm:$0xff]  ;;  %v169_v36 = vld [vmem:[%s3530_s1 + $0x4b8] sm:$0xff] }
  0xda   :  { %v300_v35 = vld [vmem:[%s3530_s1 + $0x8d0] sm:$0xff]  ;;  %1178 = vmatpush1.msra.mxu0 %v176_v30  ;;  %1249 = vmatpush1.msra.mxu1 %v304_v31  ;;  %v297_v37 = vld [vmem:[%s3530_s1 + $0x8b8] sm:$0xff] }
  0xdb   :  { %1179 = vmatprep.subr.mxu0 %v173_v32  ;;  %1250 = vmatprep.subr.mxu1 %v301_v33  ;;  %v168_v38 = vld [vmem:[%s3530_s1 + $0x4b0] sm:$0xff]  ;;  %v165_v40 = vld [vmem:[%s3530_s1 + $0x498] sm:$0xff] }
  0xdc   :  { %v296_v39 = vld [vmem:[%s3530_s1 + $0x8b0] sm:$0xff]  ;;  %1180 = vmatpush1.msra.mxu0 %v172_v34  ;;  %1251 = vmatpush1.msra.mxu1 %v300_v35  ;;  %v293_v42 = vld [vmem:[%s3530_s1 + $0x898] sm:$0xff] }
  0xdd   :  { %1181 = vmatprep.subr.mxu0 %v169_v36  ;;  %1252 = vmatprep.subr.mxu1 %v297_v37  ;;  %v164_v43 = vld [vmem:[%s3530_s1 + $0x490] sm:$0xff]  ;;  %v161_v45 = vld [vmem:[%s3530_s1 + $0x478] sm:$0xff] }
  0xde   :  { %v292_v44 = vld [vmem:[%s3530_s1 + $0x890] sm:$0xff]  ;;  %1182 = vmatpush1.msra.mxu0 %v168_v38  ;;  %1253 = vmatpush1.msra.mxu1 %v296_v39  ;;  %v289_v46 = vld [vmem:[%s3530_s1 + $0x878] sm:$0xff] }
  0xdf   :  { %1183 = vmatprep.subr.mxu0 %v165_v40  ;;  %1254 = vmatprep.subr.mxu1 %v293_v42  ;;  %v160_v47 = vld [vmem:[%s3530_s1 + $0x470] sm:$0xff]  ;;  %v157_v49 = vld [vmem:[%s3530_s1 + $0x458] sm:$0xff] }
  0xe0   :  { %v288_v48 = vld [vmem:[%s3530_s1 + $0x870] sm:$0xff]  ;;  %1184 = vmatpush1.msra.mxu0 %v164_v43  ;;  %1255 = vmatpush1.msra.mxu1 %v292_v44  ;;  %v285_v51 = vld [vmem:[%s3530_s1 + $0x858] sm:$0xff] }
  0xe1   :  { %1185 = vmatprep.subr.mxu0 %v161_v45  ;;  %1256 = vmatprep.subr.mxu1 %v289_v46  ;;  %v156_v53 = vld [vmem:[%s3530_s1 + $0x450] sm:$0xff]  ;;  %v153_v55 = vld [vmem:[%s3530_s1 + $0x438] sm:$0xff] }
  0xe2   :  { %v284_v54 = vld [vmem:[%s3530_s1 + $0x850] sm:$0xff]  ;;  %1186 = vmatpush1.msra.mxu0 %v160_v47  ;;  %1257 = vmatpush1.msra.mxu1 %v288_v48  ;;  %v281_v56 = vld [vmem:[%s3530_s1 + $0x838] sm:$0xff] }
  0xe3   :  { %1187 = vmatprep.subr.mxu0 %v157_v49  ;;  %1258 = vmatprep.subr.mxu1 %v285_v51  ;;  %v152_v57 = vld [vmem:[%s3530_s1 + $0x430] sm:$0xff]  ;;  %v149_v59 = vld [vmem:[%s3530_s1 + $0x418] sm:$0xff] }
  0xe4   :  { %v280_v58 = vld [vmem:[%s3530_s1 + $0x830] sm:$0xff]  ;;  %1188 = vmatpush1.msra.mxu0 %v156_v53  ;;  %1259 = vmatpush1.msra.mxu1 %v284_v54  ;;  %v277_v60 = vld [vmem:[%s3530_s1 + $0x818] sm:$0xff] }
  0xe5   :  { %1189 = vmatprep.subr.mxu0 %v153_v55  ;;  %1260 = vmatprep.subr.mxu1 %v281_v56  ;;  %v148_v8 = vld [vmem:[%s3530_s1 + $0x410] sm:$0xff]  ;;  %v273_v63 = vld [vmem:[%s3530_s1 + $0x7f8] sm:$0xff] }
  0xe6   :  { %v276_v61 = vld [vmem:[%s3530_s1 + $0x810] sm:$0xff]  ;;  %1190 = vmatpush1.msra.mxu0 %v152_v57  ;;  %1261 = vmatpush1.msra.mxu1 %v280_v58  ;;  %v401_v62 = vld [vmem:[%s3530_s1 + $0xbf8] sm:$0xff] }
  0xe7   :  { %1191 = vmatprep.subr.mxu0 %v149_v59  ;;  %1262 = vmatprep.subr.mxu1 %v277_v60  ;;  %v272_v0 = vld [vmem:[%s3530_s1 + $0x7f0] sm:$0xff]  ;;  %v269_v2 = vld [vmem:[%s3530_s1 + $0x7d8] sm:$0xff] }
  0xe8   :  { %v400_v1 = vld [vmem:[%s3530_s1 + $0xbf0] sm:$0xff]  ;;  %1192 = vmatpush1.msra.mxu0 %v148_v8  ;;  %1263 = vmatpush1.msra.mxu1 %v276_v61  ;;  %v397_v4 = vld [vmem:[%s3530_s1 + $0xbd8] sm:$0xff] }
  0xe9   :  { %1193 = vmatprep.subr.mxu0 %v273_v63  ;;  %1264 = vmatprep.subr.mxu1 %v401_v62  ;;  %v268_v5 = vld [vmem:[%s3530_s1 + $0x7d0] sm:$0xff]  ;;  %v265_v7 = vld [vmem:[%s3530_s1 + $0x7b8] sm:$0xff] }
  0xea   :  { %v396_v6 = vld [vmem:[%s3530_s1 + $0xbd0] sm:$0xff]  ;;  %1194 = vmatpush2.msra.mxu0 %v272_v0  ;;  %1265 = vmatpush2.msra.mxu1 %v400_v1  ;;  %v393_v9 = vld [vmem:[%s3530_s1 + $0xbb8] sm:$0xff] }
  0xeb   :  { %1195 = vmatprep.subr.mxu0 %v269_v2  ;;  %1266 = vmatprep.subr.mxu1 %v397_v4  ;;  %v264_v10 = vld [vmem:[%s3530_s1 + $0x7b0] sm:$0xff]  ;;  %v261_v13 = vld [vmem:[%s3530_s1 + $0x798] sm:$0xff] }
  0xec   :  { %v392_v12 = vld [vmem:[%s3530_s1 + $0xbb0] sm:$0xff]  ;;  %1196 = vmatpush2.msra.mxu0 %v268_v5  ;;  %1267 = vmatpush2.msra.mxu1 %v396_v6  ;;  %v389_v14 = vld [vmem:[%s3530_s1 + $0xb98] sm:$0xff] }
  0xed   :  { %1197 = vmatprep.subr.mxu0 %v265_v7  ;;  %1268 = vmatprep.subr.mxu1 %v393_v9  ;;  %v260_v15 = vld [vmem:[%s3530_s1 + $0x790] sm:$0xff]  ;;  %v257_v18 = vld [vmem:[%s3530_s1 + $0x778] sm:$0xff] }
  0xee   :  { %v388_v17 = vld [vmem:[%s3530_s1 + $0xb90] sm:$0xff]  ;;  %1198 = vmatpush2.msra.mxu0 %v264_v10  ;;  %1269 = vmatpush2.msra.mxu1 %v392_v12  ;;  %v385_v19 = vld [vmem:[%s3530_s1 + $0xb78] sm:$0xff] }
  0xef   :  { %1199 = vmatprep.subr.mxu0 %v261_v13  ;;  %1270 = vmatprep.subr.mxu1 %v389_v14  ;;  %v256_v20 = vld [vmem:[%s3530_s1 + $0x770] sm:$0xff]  ;;  %v253_v23 = vld [vmem:[%s3530_s1 + $0x758] sm:$0xff] }
  0xf0   :  { %v384_v22 = vld [vmem:[%s3530_s1 + $0xb70] sm:$0xff]  ;;  %1200 = vmatpush2.msra.mxu0 %v260_v15  ;;  %1271 = vmatpush2.msra.mxu1 %v388_v17  ;;  %v381_v24 = vld [vmem:[%s3530_s1 + $0xb58] sm:$0xff] }
  0xf1   :  { %1201 = vmatprep.subr.mxu0 %v257_v18  ;;  %1272 = vmatprep.subr.mxu1 %v385_v19  ;;  %v252_v25 = vld [vmem:[%s3530_s1 + $0x750] sm:$0xff]  ;;  %v249_v28 = vld [vmem:[%s3530_s1 + $0x738] sm:$0xff] }
  0xf2   :  { %v380_v27 = vld [vmem:[%s3530_s1 + $0xb50] sm:$0xff]  ;;  %1202 = vmatpush2.msra.mxu0 %v256_v20  ;;  %1273 = vmatpush2.msra.mxu1 %v384_v22  ;;  %v377_v30 = vld [vmem:[%s3530_s1 + $0xb38] sm:$0xff] }
  0xf3   :  { %1203 = vmatprep.subr.mxu0 %v253_v23  ;;  %1274 = vmatprep.subr.mxu1 %v381_v24  ;;  %v248_v31 = vld [vmem:[%s3530_s1 + $0x730] sm:$0xff]  ;;  %v245_v33 = vld [vmem:[%s3530_s1 + $0x718] sm:$0xff] }
  0xf4   :  { %v376_v32 = vld [vmem:[%s3530_s1 + $0xb30] sm:$0xff]  ;;  %1204 = vmatpush2.msra.mxu0 %v252_v25  ;;  %1275 = vmatpush2.msra.mxu1 %v380_v27  ;;  %v373_v34 = vld [vmem:[%s3530_s1 + $0xb18] sm:$0xff] }
  0xf5   :  { %1205 = vmatprep.subr.mxu0 %v249_v28  ;;  %1276 = vmatprep.subr.mxu1 %v377_v30  ;;  %v244_v35 = vld [vmem:[%s3530_s1 + $0x710] sm:$0xff]  ;;  %v241_v37 = vld [vmem:[%s3530_s1 + $0x6f8] sm:$0xff] }
  0xf6   :  { %v372_v36 = vld [vmem:[%s3530_s1 + $0xb10] sm:$0xff]  ;;  %1206 = vmatpush2.msra.mxu0 %v248_v31  ;;  %1277 = vmatpush2.msra.mxu1 %v376_v32  ;;  %v369_v38 = vld [vmem:[%s3530_s1 + $0xaf8] sm:$0xff] }
  0xf7   :  { %1207 = vmatprep.subr.mxu0 %v245_v33  ;;  %1278 = vmatprep.subr.mxu1 %v373_v34  ;;  %v240_v39 = vld [vmem:[%s3530_s1 + $0x6f0] sm:$0xff]  ;;  %v237_v42 = vld [vmem:[%s3530_s1 + $0x6d8] sm:$0xff] }
  0xf8   :  { %v368_v40 = vld [vmem:[%s3530_s1 + $0xaf0] sm:$0xff]  ;;  %1208 = vmatpush2.msra.mxu0 %v244_v35  ;;  %1279 = vmatpush2.msra.mxu1 %v372_v36  ;;  %v365_v43 = vld [vmem:[%s3530_s1 + $0xad8] sm:$0xff] }
  0xf9   :  { %1209 = vmatprep.subr.mxu0 %v241_v37  ;;  %1280 = vmatprep.subr.mxu1 %v369_v38  ;;  %v236_v44 = vld [vmem:[%s3530_s1 + $0x6d0] sm:$0xff]  ;;  %v233_v46 = vld [vmem:[%s3530_s1 + $0x6b8] sm:$0xff] }
  0xfa   :  { %v364_v45 = vld [vmem:[%s3530_s1 + $0xad0] sm:$0xff]  ;;  %1210 = vmatpush2.msra.mxu0 %v240_v39  ;;  %1281 = vmatpush2.msra.mxu1 %v368_v40  ;;  %v361_v47 = vld [vmem:[%s3530_s1 + $0xab8] sm:$0xff] }
  0xfb   :  { %1211 = vmatprep.subr.mxu0 %v237_v42  ;;  %1282 = vmatprep.subr.mxu1 %v365_v43  ;;  %v232_v48 = vld [vmem:[%s3530_s1 + $0x6b0] sm:$0xff]  ;;  %v229_v51 = vld [vmem:[%s3530_s1 + $0x698] sm:$0xff] }
  0xfc   :  { %v360_v49 = vld [vmem:[%s3530_s1 + $0xab0] sm:$0xff]  ;;  %1212 = vmatpush2.msra.mxu0 %v236_v44  ;;  %1283 = vmatpush2.msra.mxu1 %v364_v45  ;;  %v357_v53 = vld [vmem:[%s3530_s1 + $0xa98] sm:$0xff] }
  0xfd   :  { %1213 = vmatprep.subr.mxu0 %v233_v46  ;;  %1284 = vmatprep.subr.mxu1 %v361_v47  ;;  %v228_v54 = vld [vmem:[%s3530_s1 + $0x690] sm:$0xff]  ;;  %v225_v56 = vld [vmem:[%s3530_s1 + $0x678] sm:$0xff] }
  0xfe   :  { %v356_v55 = vld [vmem:[%s3530_s1 + $0xa90] sm:$0xff]  ;;  %1214 = vmatpush2.msra.mxu0 %v232_v48  ;;  %1285 = vmatpush2.msra.mxu1 %v360_v49  ;;  %v353_v57 = vld [vmem:[%s3530_s1 + $0xa78] sm:$0xff] }
  0xff   :  { %1215 = vmatprep.subr.mxu0 %v229_v51  ;;  %1286 = vmatprep.subr.mxu1 %v357_v53  ;;  %v224_v58 = vld [vmem:[%s3530_s1 + $0x670] sm:$0xff]  ;;  %v221_v60 = vld [vmem:[%s3530_s1 + $0x658] sm:$0xff] }
 0x100   :  { %v352_v59 = vld [vmem:[%s3530_s1 + $0xa70] sm:$0xff]  ;;  %1216 = vmatpush2.msra.mxu0 %v228_v54  ;;  %1287 = vmatpush2.msra.mxu1 %v356_v55  ;;  %v349_v8 = vld [vmem:[%s3530_s1 + $0xa58] sm:$0xff] }
 0x101   :  { %1217 = vmatprep.subr.mxu0 %v225_v56  ;;  %1288 = vmatprep.subr.mxu1 %v353_v57  ;;  %v220_v61 = vld [vmem:[%s3530_s1 + $0x650] sm:$0xff]  ;;  %v217_v62 = vld [vmem:[%s3530_s1 + $0x638] sm:$0xff] }
 0x102   :  { %v348_v63 = vld [vmem:[%s3530_s1 + $0xa50] sm:$0xff]  ;;  %1218 = vmatpush2.msra.mxu0 %v224_v58  ;;  %1289 = vmatpush2.msra.mxu1 %v352_v59  ;;  %v345_v0 = vld [vmem:[%s3530_s1 + $0xa38] sm:$0xff] }
 0x103   :  { %1219 = vmatprep.subr.mxu0 %v221_v60  ;;  %1290 = vmatprep.subr.mxu1 %v349_v8  ;;  %v216_v1 = vld [vmem:[%s3530_s1 + $0x630] sm:$0xff]  ;;  %v213_v4 = vld [vmem:[%s3530_s1 + $0x618] sm:$0xff] }
 0x104   :  { %v344_v2 = vld [vmem:[%s3530_s1 + $0xa30] sm:$0xff]  ;;  %1220 = vmatpush2.msra.mxu0 %v220_v61  ;;  %1291 = vmatpush2.msra.mxu1 %v348_v63  ;;  %v341_v5 = vld [vmem:[%s3530_s1 + $0xa18] sm:$0xff] }
 0x105   :  { %1221 = vmatprep.subr.mxu0 %v217_v62  ;;  %1292 = vmatprep.subr.mxu1 %v345_v0  ;;  %v212_v6 = vld [vmem:[%s3530_s1 + $0x610] sm:$0xff]  ;;  %v465_v9 = vld [vmem:[%s3530_s1 + $0xdf8] sm:$0xff] }
 0x106   :  { %1222 = vmatpush2.msra.mxu0 %v216_v1  ;;  %1293 = vmatpush2.msra.mxu1 %v344_v2  ;;  %v340_v7 = vld [vmem:[%s3530_s1 + $0xa10] sm:$0xff]  ;;  %v593_v10 = vld [vmem:[%s3530_s1 + $0x11f8] sm:$0xff] }
 0x107   :  { %1223 = vmatprep.subr.mxu0 %v213_v4  ;;  %1294 = vmatprep.subr.mxu1 %v341_v5  ;;  %v464_v12 = vld [vmem:[%s3530_s1 + $0xdf0] sm:$0xff]  ;;  %v589_v14 = vld [vmem:[%s3530_s1 + $0x11d8] sm:$0xff] }
 0x108   :  { %1224 = vmatpush2.msra.mxu0 %v212_v6  ;;  %1225 = vmatprep.mubr.f32.mxu0 %v1936_v11  ;;  %v592_v13 = vld [vmem:[%s3530_s1 + $0x11f0] sm:$0xff]  ;;  %v461_v11 = vld [vmem:[%s3530_s1 + $0xdd8] sm:$0xff] }
 0x109   :  { %1295 = vmatpush2.msra.mxu1 %v340_v7  ;;  %1226 = vmatmul.mubr.f32.vlgmr.msra.gmra.mxu0 %v1910_v3  ;;  %v460_v3 = vld [vmem:[%s3530_s1 + $0xdd0] sm:$0xff]  ;;  %v457_v15 = vld [vmem:[%s3530_s1 + $0xdb8] sm:$0xff] }
 0x10a   :  { %1296 = vmatprep.mubr.f32.mxu1 %v2331_v26  ;;  %1303 = vmatprep.subr.mxu0 %v465_v9  ;;  %v588_v26 = vld [vmem:[%s3530_s1 + $0x11d0] sm:$0xff]  ;;  %v585_v17 = vld [vmem:[%s3530_s1 + $0x11b8] sm:$0xff] }
 0x10b   :  { %1374 = vmatprep.subr.mxu1 %v593_v10  ;;  %1297 = vmatmul.mubr.f32.vlgmr.msra.gmra.mxu1 %v2300_v16  ;;  %v456_v16 = vld [vmem:[%s3530_s1 + $0xdb0] sm:$0xff]  ;;  %v453_v19 = vld [vmem:[%s3530_s1 + $0xd98] sm:$0xff] }
 0x10c   :  { %1304 = vmatpush1.msra.mxu0 %v464_v12  ;;  %1375 = vmatpush1.msra.mxu1 %v592_v13  ;;  %v584_v18 = vld [vmem:[%s3530_s1 + $0x11b0] sm:$0xff]  ;;  %v581_v20 = vld [vmem:[%s3530_s1 + $0x1198] sm:$0xff] }
 0x10d   :  { %1305 = vmatprep.subr.mxu0 %v461_v11  ;;  %1376 = vmatprep.subr.mxu1 %v589_v14  ;;  %v452_v22 = vld [vmem:[%s3530_s1 + $0xd90] sm:$0xff]  ;;  %v449_v24 = vld [vmem:[%s3530_s1 + $0xd78] sm:$0xff] }
 0x10e   :  { %1306 = vmatpush1.msra.mxu0 %v460_v3  ;;  %1377 = vmatpush1.msra.mxu1 %v588_v26  ;;  %v580_v23 = vld [vmem:[%s3530_s1 + $0x1190] sm:$0xff]  ;;  %v577_v25 = vld [vmem:[%s3530_s1 + $0x1178] sm:$0xff] }
 0x10f   :  { %1307 = vmatprep.subr.mxu0 %v457_v15  ;;  %1378 = vmatprep.subr.mxu1 %v585_v17  ;;  %v448_v27 = vld [vmem:[%s3530_s1 + $0xd70] sm:$0xff]  ;;  %v445_v30 = vld [vmem:[%s3530_s1 + $0xd58] sm:$0xff] }
 0x110   :  { %1308 = vmatpush1.msra.mxu0 %v456_v16  ;;  %1379 = vmatpush1.msra.mxu1 %v584_v18  ;;  %v576_v28 = vld [vmem:[%s3530_s1 + $0x1170] sm:$0xff]  ;;  %v573_v31 = vld [vmem:[%s3530_s1 + $0x1158] sm:$0xff] }
 0x111   :  { %1309 = vmatprep.subr.mxu0 %v453_v19  ;;  %1380 = vmatprep.subr.mxu1 %v581_v20  ;;  %v444_v32 = vld [vmem:[%s3530_s1 + $0xd50] sm:$0xff]  ;;  %v441_v34 = vld [vmem:[%s3530_s1 + $0xd38] sm:$0xff] }
 0x112   :  { %1310 = vmatpush1.msra.mxu0 %v452_v22  ;;  %1381 = vmatpush1.msra.mxu1 %v580_v23  ;;  %v572_v33 = vld [vmem:[%s3530_s1 + $0x1150] sm:$0xff]  ;;  %v569_v35 = vld [vmem:[%s3530_s1 + $0x1138] sm:$0xff] }
 0x113   :  { %1311 = vmatprep.subr.mxu0 %v449_v24  ;;  %1382 = vmatprep.subr.mxu1 %v577_v25  ;;  %v440_v36 = vld [vmem:[%s3530_s1 + $0xd30] sm:$0xff]  ;;  %v437_v38 = vld [vmem:[%s3530_s1 + $0xd18] sm:$0xff] }
 0x114   :  { %1312 = vmatpush1.msra.mxu0 %v448_v27  ;;  %1383 = vmatpush1.msra.mxu1 %v576_v28  ;;  %v568_v37 = vld [vmem:[%s3530_s1 + $0x1130] sm:$0xff]  ;;  %v565_v39 = vld [vmem:[%s3530_s1 + $0x1118] sm:$0xff] }
 0x115   :  { %1313 = vmatprep.subr.mxu0 %v445_v30  ;;  %1384 = vmatprep.subr.mxu1 %v573_v31  ;;  %v436_v40 = vld [vmem:[%s3530_s1 + $0xd10] sm:$0xff]  ;;  %v433_v43 = vld [vmem:[%s3530_s1 + $0xcf8] sm:$0xff] }
 0x116   :  { %1314 = vmatpush1.msra.mxu0 %v444_v32  ;;  %1385 = vmatpush1.msra.mxu1 %v572_v33  ;;  %v564_v42 = vld [vmem:[%s3530_s1 + $0x1110] sm:$0xff]  ;;  %v561_v44 = vld [vmem:[%s3530_s1 + $0x10f8] sm:$0xff] }
 0x117   :  { %1315 = vmatprep.subr.mxu0 %v441_v34  ;;  %1386 = vmatprep.subr.mxu1 %v569_v35  ;;  %v432_v45 = vld [vmem:[%s3530_s1 + $0xcf0] sm:$0xff]  ;;  %v429_v47 = vld [vmem:[%s3530_s1 + $0xcd8] sm:$0xff] }
 0x118   :  { %1316 = vmatpush1.msra.mxu0 %v440_v36  ;;  %1387 = vmatpush1.msra.mxu1 %v568_v37  ;;  %v560_v46 = vld [vmem:[%s3530_s1 + $0x10f0] sm:$0xff]  ;;  %v557_v48 = vld [vmem:[%s3530_s1 + $0x10d8] sm:$0xff] }
 0x119   :  { %1317 = vmatprep.subr.mxu0 %v437_v38  ;;  %1388 = vmatprep.subr.mxu1 %v565_v39  ;;  %v428_v49 = vld [vmem:[%s3530_s1 + $0xcd0] sm:$0xff]  ;;  %v425_v53 = vld [vmem:[%s3530_s1 + $0xcb8] sm:$0xff] }
 0x11a   :  { %1318 = vmatpush1.msra.mxu0 %v436_v40  ;;  %1389 = vmatpush1.msra.mxu1 %v564_v42  ;;  %v556_v51 = vld [vmem:[%s3530_s1 + $0x10d0] sm:$0xff]  ;;  %v553_v54 = vld [vmem:[%s3530_s1 + $0x10b8] sm:$0xff] }
 0x11b   :  { %1319 = vmatprep.subr.mxu0 %v433_v43  ;;  %1390 = vmatprep.subr.mxu1 %v561_v44  ;;  %v424_v55 = vld [vmem:[%s3530_s1 + $0xcb0] sm:$0xff]  ;;  %v421_v57 = vld [vmem:[%s3530_s1 + $0xc98] sm:$0xff] }
 0x11c   :  { %1320 = vmatpush1.msra.mxu0 %v432_v45  ;;  %1391 = vmatpush1.msra.mxu1 %v560_v46  ;;  %v552_v56 = vld [vmem:[%s3530_s1 + $0x10b0] sm:$0xff]  ;;  %v549_v58 = vld [vmem:[%s3530_s1 + $0x1098] sm:$0xff] }
 0x11d   :  { %1321 = vmatprep.subr.mxu0 %v429_v47  ;;  %1392 = vmatprep.subr.mxu1 %v557_v48  ;;  %v420_v59 = vld [vmem:[%s3530_s1 + $0xc90] sm:$0xff]  ;;  %v417_v8 = vld [vmem:[%s3530_s1 + $0xc78] sm:$0xff] }
 0x11e   :  { %1322 = vmatpush1.msra.mxu0 %v428_v49  ;;  %1393 = vmatpush1.msra.mxu1 %v556_v51  ;;  %v548_v60 = vld [vmem:[%s3530_s1 + $0x1090] sm:$0xff]  ;;  %v545_v61 = vld [vmem:[%s3530_s1 + $0x1078] sm:$0xff] }
 0x11f   :  { %1323 = vmatprep.subr.mxu0 %v425_v53  ;;  %1394 = vmatprep.subr.mxu1 %v553_v54  ;;  %v416_v63 = vld [vmem:[%s3530_s1 + $0xc70] sm:$0xff]  ;;  %v413_v0 = vld [vmem:[%s3530_s1 + $0xc58] sm:$0xff] }
 0x120   :  { %1324 = vmatpush1.msra.mxu0 %v424_v55  ;;  %1395 = vmatpush1.msra.mxu1 %v552_v56  ;;  %v544_v62 = vld [vmem:[%s3530_s1 + $0x1070] sm:$0xff]  ;;  %v541_v1 = vld [vmem:[%s3530_s1 + $0x1058] sm:$0xff] }
 0x121   :  { %1325 = vmatprep.subr.mxu0 %v421_v57  ;;  %1396 = vmatprep.subr.mxu1 %v549_v58  ;;  %v412_v2 = vld [vmem:[%s3530_s1 + $0xc50] sm:$0xff]  ;;  %v409_v5 = vld [vmem:[%s3530_s1 + $0xc38] sm:$0xff] }
 0x122   :  { %1326 = vmatpush1.msra.mxu0 %v420_v59  ;;  %1397 = vmatpush1.msra.mxu1 %v548_v60  ;;  %v540_v4 = vld [vmem:[%s3530_s1 + $0x1050] sm:$0xff]  ;;  %v537_v6 = vld [vmem:[%s3530_s1 + $0x1038] sm:$0xff] }
 0x123   :  { %1327 = vmatprep.subr.mxu0 %v417_v8  ;;  %1398 = vmatprep.subr.mxu1 %v545_v61  ;;  %v408_v7 = vld [vmem:[%s3530_s1 + $0xc30] sm:$0xff]  ;;  %v405_v10 = vld [vmem:[%s3530_s1 + $0xc18] sm:$0xff] }
 0x124   :  { %1328 = vmatpush1.msra.mxu0 %v416_v63  ;;  %1399 = vmatpush1.msra.mxu1 %v544_v62  ;;  %v536_v9 = vld [vmem:[%s3530_s1 + $0x1030] sm:$0xff]  ;;  %v533_v12 = vld [vmem:[%s3530_s1 + $0x1018] sm:$0xff] }
 0x125   :  { %1329 = vmatprep.subr.mxu0 %v413_v0  ;;  %1400 = vmatprep.subr.mxu1 %v541_v1  ;;  %v404_v13 = vld [vmem:[%s3530_s1 + $0xc10] sm:$0xff]  ;;  %v529_v14 = vld [vmem:[%s3530_s1 + $0xff8] sm:$0xff] }
 0x126   :  { %1330 = vmatpush1.msra.mxu0 %v412_v2  ;;  %1401 = vmatpush1.msra.mxu1 %v540_v4  ;;  %v532_v11 = vld [vmem:[%s3530_s1 + $0x1010] sm:$0xff]  ;;  %v657_v3 = vld [vmem:[%s3530_s1 + $0x13f8] sm:$0xff] }
 0x127   :  { %1331 = vmatprep.subr.mxu0 %v409_v5  ;;  %1402 = vmatprep.subr.mxu1 %v537_v6  ;;  %v528_v26 = vld [vmem:[%s3530_s1 + $0xff0] sm:$0xff]  ;;  %v525_v17 = vld [vmem:[%s3530_s1 + $0xfd8] sm:$0xff] }
 0x128   :  { %1332 = vmatpush1.msra.mxu0 %v408_v7  ;;  %1403 = vmatpush1.msra.mxu1 %v536_v9  ;;  %v656_v15 = vld [vmem:[%s3530_s1 + $0x13f0] sm:$0xff]  ;;  %v653_v16 = vld [vmem:[%s3530_s1 + $0x13d8] sm:$0xff] }
 0x129   :  { %1333 = vmatprep.subr.mxu0 %v405_v10  ;;  %1404 = vmatprep.subr.mxu1 %v533_v12  ;;  %v524_v18 = vld [vmem:[%s3530_s1 + $0xfd0] sm:$0xff]  ;;  %v521_v20 = vld [vmem:[%s3530_s1 + $0xfb8] sm:$0xff] }
 0x12a   :  { %1334 = vmatpush1.msra.mxu0 %v404_v13  ;;  %1405 = vmatpush1.msra.mxu1 %v532_v11  ;;  %v652_v19 = vld [vmem:[%s3530_s1 + $0x13d0] sm:$0xff]  ;;  %v649_v22 = vld [vmem:[%s3530_s1 + $0x13b8] sm:$0xff] }
 0x12b   :  { %1335 = vmatprep.subr.mxu0 %v529_v14  ;;  %1406 = vmatprep.subr.mxu1 %v657_v3  ;;  %v520_v23 = vld [vmem:[%s3530_s1 + $0xfb0] sm:$0xff]  ;;  %v517_v25 = vld [vmem:[%s3530_s1 + $0xf98] sm:$0xff] }
 0x12c   :  { %1336 = vmatpush2.msra.mxu0 %v528_v26  ;;  %1407 = vmatpush2.msra.mxu1 %v656_v15  ;;  %v648_v24 = vld [vmem:[%s3530_s1 + $0x13b0] sm:$0xff]  ;;  %v645_v27 = vld [vmem:[%s3530_s1 + $0x1398] sm:$0xff] }
 0x12d   :  { %1337 = vmatprep.subr.mxu0 %v525_v17  ;;  %1408 = vmatprep.subr.mxu1 %v653_v16  ;;  %v516_v28 = vld [vmem:[%s3530_s1 + $0xf90] sm:$0xff]  ;;  %v513_v31 = vld [vmem:[%s3530_s1 + $0xf78] sm:$0xff] }
 0x12e   :  { %1338 = vmatpush2.msra.mxu0 %v524_v18  ;;  %1409 = vmatpush2.msra.mxu1 %v652_v19  ;;  %v644_v30 = vld [vmem:[%s3530_s1 + $0x1390] sm:$0xff]  ;;  %v641_v32 = vld [vmem:[%s3530_s1 + $0x1378] sm:$0xff]  ;;  %v801_v18 = vpop.f32.mrf.mxu0  ;;  %v872_v19 = vpop.f32.mrf.mxu1 }
 0x12f   :  { %1339 = vmatprep.subr.mxu0 %v521_v20  ;;  %1410 = vmatprep.subr.mxu1 %v649_v22  ;;  %v512_v33 = vld [vmem:[%s3530_s1 + $0xf70] sm:$0xff]  ;;  %v509_v35 = vld [vmem:[%s3530_s1 + $0xf58] sm:$0xff] }
 0x130   :  { %1340 = vmatpush2.msra.mxu0 %v520_v23  ;;  %1411 = vmatpush2.msra.mxu1 %v648_v24  ;;  %v640_v34 = vld [vmem:[%s3530_s1 + $0x1370] sm:$0xff]  ;;  %v637_v36 = vld [vmem:[%s3530_s1 + $0x1358] sm:$0xff]  ;;  %v803_v20 = vpop.f32.mrf.mxu0  ;;  %v874_v23 = vpop.f32.mrf.mxu1  ;;  %v666_v24 = vsub.s32 1, %v1838_v41 }
 0x131   :  { %1341 = vmatprep.subr.mxu0 %v517_v25  ;;  %1412 = vmatprep.subr.mxu1 %v645_v27  ;;  %v508_v37 = vld [vmem:[%s3530_s1 + $0xf50] sm:$0xff]  ;;  %v505_v39 = vld [vmem:[%s3530_s1 + $0xf38] sm:$0xff] }
 0x132   :  { %1342 = vmatpush2.msra.mxu0 %v516_v28  ;;  %1413 = vmatpush2.msra.mxu1 %v644_v30  ;;  %v636_v38 = vld [vmem:[%s3530_s1 + $0x1350] sm:$0xff]  ;;  %v633_v40 = vld [vmem:[%s3530_s1 + $0x1338] sm:$0xff]  ;;  %v670_v30 = vsub.s32 2, %v1838_v41 }
 0x133   :  { %1343 = vmatprep.subr.mxu0 %v513_v31  ;;  %1414 = vmatprep.subr.mxu1 %v641_v32  ;;  %v504_v42 = vld [vmem:[%s3530_s1 + $0xf30] sm:$0xff]  ;;  %v501_v44 = vld [vmem:[%s3530_s1 + $0xf18] sm:$0xff] }
 0x134   :  { %1344 = vmatpush2.msra.mxu0 %v512_v33  ;;  %1415 = vmatpush2.msra.mxu1 %v640_v34  ;;  %v632_v43 = vld [vmem:[%s3530_s1 + $0x1330] sm:$0xff]  ;;  %v629_v45 = vld [vmem:[%s3530_s1 + $0x1318] sm:$0xff]  ;;  %v674_v33 = vsub.s32 3, %v1838_v41 }
 0x135   :  { %1345 = vmatprep.subr.mxu0 %v509_v35  ;;  %1416 = vmatprep.subr.mxu1 %v637_v36  ;;  %v500_v46 = vld [vmem:[%s3530_s1 + $0xf10] sm:$0xff]  ;;  %v497_v48 = vld [vmem:[%s3530_s1 + $0xef8] sm:$0xff] }
 0x136   :  { %1346 = vmatpush2.msra.mxu0 %v508_v37  ;;  %1417 = vmatpush2.msra.mxu1 %v636_v38  ;;  %v628_v47 = vld [vmem:[%s3530_s1 + $0x1310] sm:$0xff]  ;;  %v625_v49 = vld [vmem:[%s3530_s1 + $0x12f8] sm:$0xff] }
 0x137   :  { %1347 = vmatprep.subr.mxu0 %v505_v39  ;;  %1418 = vmatprep.subr.mxu1 %v633_v40  ;;  %v496_v51 = vld [vmem:[%s3530_s1 + $0xef0] sm:$0xff]  ;;  %v493_v54 = vld [vmem:[%s3530_s1 + $0xed8] sm:$0xff] }
 0x138   :  { %1348 = vmatpush2.msra.mxu0 %v504_v42  ;;  %1419 = vmatpush2.msra.mxu1 %v632_v43  ;;  %v624_v53 = vld [vmem:[%s3530_s1 + $0x12f0] sm:$0xff]  ;;  %v621_v55 = vld [vmem:[%s3530_s1 + $0x12d8] sm:$0xff] }
 0x139   :  { %1349 = vmatprep.subr.mxu0 %v501_v44  ;;  %1420 = vmatprep.subr.mxu1 %v629_v45  ;;  %v492_v56 = vld [vmem:[%s3530_s1 + $0xed0] sm:$0xff]  ;;  %v489_v58 = vld [vmem:[%s3530_s1 + $0xeb8] sm:$0xff] }
 0x13a   :  { %1350 = vmatpush2.msra.mxu0 %v500_v46  ;;  %1421 = vmatpush2.msra.mxu1 %v628_v47  ;;  %v620_v57 = vld [vmem:[%s3530_s1 + $0x12d0] sm:$0xff]  ;;  %v617_v59 = vld [vmem:[%s3530_s1 + $0x12b8] sm:$0xff] }
 0x13b   :  { %1351 = vmatprep.subr.mxu0 %v497_v48  ;;  %1422 = vmatprep.subr.mxu1 %v625_v49  ;;  %v488_v60 = vld [vmem:[%s3530_s1 + $0xeb0] sm:$0xff]  ;;  %v485_v61 = vld [vmem:[%s3530_s1 + $0xe98] sm:$0xff] }
 0x13c   :  { %1352 = vmatpush2.msra.mxu0 %v496_v51  ;;  %1423 = vmatpush2.msra.mxu1 %v624_v53  ;;  %v616_v8 = vld [vmem:[%s3530_s1 + $0x12b0] sm:$0xff]  ;;  %v613_v63 = vld [vmem:[%s3530_s1 + $0x1298] sm:$0xff] }
 0x13d   :  { %1353 = vmatprep.subr.mxu0 %v493_v54  ;;  %1424 = vmatprep.subr.mxu1 %v621_v55  ;;  %v484_v62 = vld [vmem:[%s3530_s1 + $0xe90] sm:$0xff]  ;;  %v481_v1 = vld [vmem:[%s3530_s1 + $0xe78] sm:$0xff] }
 0x13e   :  { %1354 = vmatpush2.msra.mxu0 %v492_v56  ;;  %1425 = vmatpush2.msra.mxu1 %v620_v57  ;;  %v612_v0 = vld [vmem:[%s3530_s1 + $0x1290] sm:$0xff]  ;;  %v609_v2 = vld [vmem:[%s3530_s1 + $0x1278] sm:$0xff] }
 0x13f   :  { %1355 = vmatprep.subr.mxu0 %v489_v58  ;;  %1426 = vmatprep.subr.mxu1 %v617_v59  ;;  %v480_v4 = vld [vmem:[%s3530_s1 + $0xe70] sm:$0xff]  ;;  %v477_v6 = vld [vmem:[%s3530_s1 + $0xe58] sm:$0xff] }
 0x140   :  { %1356 = vmatpush2.msra.mxu0 %v488_v60  ;;  %1427 = vmatpush2.msra.mxu1 %v616_v8  ;;  %v608_v5 = vld [vmem:[%s3530_s1 + $0x1270] sm:$0xff]  ;;  %v605_v7 = vld [vmem:[%s3530_s1 + $0x1258] sm:$0xff] }
 0x141   :  { %1357 = vmatprep.subr.mxu0 %v485_v61  ;;  %1428 = vmatprep.subr.mxu1 %v613_v63  ;;  %v476_v9 = vld [vmem:[%s3530_s1 + $0xe50] sm:$0xff]  ;;  %v473_v12 = vld [vmem:[%s3530_s1 + $0xe38] sm:$0xff] }
 0x142   :  { %1358 = vmatpush2.msra.mxu0 %v484_v62  ;;  %1429 = vmatpush2.msra.mxu1 %v612_v0  ;;  %v604_v10 = vld [vmem:[%s3530_s1 + $0x1250] sm:$0xff]  ;;  %v601_v13 = vld [vmem:[%s3530_s1 + $0x1238] sm:$0xff] }
 0x143   :  { %1359 = vmatprep.subr.mxu0 %v481_v1  ;;  %1430 = vmatprep.subr.mxu1 %v609_v2  ;;  %v472_v11 = vld [vmem:[%s3530_s1 + $0xe30] sm:$0xff]  ;;  %v469_v3 = vld [vmem:[%s3530_s1 + $0xe18] sm:$0xff] }
 0x144   :  { %1360 = vmatpush2.msra.mxu0 %v480_v4  ;;  %1431 = vmatpush2.msra.mxu1 %v608_v5  ;;  %v600_v14 = vld [vmem:[%s3530_s1 + $0x1230] sm:$0xff]  ;;  %v597_v26 = vld [vmem:[%s3530_s1 + $0x1218] sm:$0xff] }
 0x145   :  { %1361 = vmatprep.subr.mxu0 %v477_v6  ;;  %1432 = vmatprep.subr.mxu1 %v605_v7  ;;  %v468_v15 = vld [vmem:[%s3530_s1 + $0xe10] sm:$0xff]  ;;  %v943_v22 = vpop.f32.mrf.mxu0 }
 0x146   :  { %1362 = vmatpush2.msra.mxu0 %v476_v9  ;;  %1433 = vmatpush2.msra.mxu1 %v604_v10  ;;  %v596_v17 = vld [vmem:[%s3530_s1 + $0x1210] sm:$0xff] }
 0x147   :  { %1363 = vmatprep.subr.mxu0 %v473_v12  ;;  %1434 = vmatprep.subr.mxu1 %v601_v13  ;;  %v1487_v16 = vld.sshfl [vmem:[%s3529_s0 + $0x10] sm:$0x33 pattern:$0x76325410]  ;;  %v1014_v25 = vpop.f32.mrf.mxu1  ;;  %s1511_s0 = smov [#allocation2]  }
 0x148   :  { %1364 = vmatpush2.msra.mxu0 %v472_v11  ;;  %1435 = vmatpush2.msra.mxu1 %v600_v14 }
 0x149   :  { %1365 = vmatprep.subr.mxu0 %v469_v3  ;;  %1436 = vmatprep.subr.mxu1 %v597_v26  ;;  %v1016_v31 = vpop.f32.mrf.mxu1 }
 0x14a   :  { %1366 = vmatpush2.msra.mxu0 %v468_v15  ;;  %1367 = vmatprep.mubr.f32.mxu0 %v2341_v29  ;;  %v658_v29 = vld [vmem:[%s3531_s2] sm:$0xf]  ;;  %s1474_s2 = sshll.u32 %s1511_s0, 4  ;;  %s1475_s2 = int_to_ptr.vmem [resolvable:$true] %s1474_s2 }
 0x14b   :  { %1437 = vmatpush2.msra.mxu1 %v596_v17  ;;  %1438 = vmatprep.mubr.f32.mxu1 %v2728_v50  ;;  %v945_v50 = vpop.f32.mrf.mxu0  ;;  %v667_v28 = vrot.slane %v658_v29, %v666_v24  ;;  %v671_v37 = vrot.slane %v658_v29, %v670_v30  ;;  %v675_v40 = vrot.slane %v658_v29, %v674_v33  ;;  %s1488_s5 = scalar_lea.vmem %s1475_s2, 128  ;;  %p1493_p1 = scmp.lt.s32.totalorder %s1475_s2, %s1475_s2 }
 0x14c   :  { %1368 = vmatmul.mubr.f32.vlgmr.msra.gmra.mxu0 %v2315_v21  ;;  %1439 = vmatmul.mubr.f32.vlgmr.msra.gmra.mxu1 %v1487_v16  ;;  %v662_v21 = vsub.s32 0, %v1838_v41  ;;  %p1489_p0 = scmp.ne.s32.totalorder %s1475_s2, %s1488_s5  ;;  %p1494_p2 = scmp.lt.s32.totalorder %s1488_s5, %s1488_s5 }
 0x14d   :  { %v804_v36 = vadd.f32 %v803_v20, %v667_v28 }
 0x14e   :  { %v663_v32 = vrot.slane %v658_v29, %v662_v21  ;;  %p1495_p3 = por %p1494_p2, %p1493_p1 }
 0x14f   :  { %v875_v43 = vadd.f32 %v874_v23, %v804_v36 }
 0x150   :  { %v802_v39 = vadd.f32 %v801_v18, %v663_v32  ;;  %p1496_p4 = pnand %p1495_p3, %p1489_p0 }
 0x151   :  { %v946_v48 = vadd.f32 %v945_v50, %v875_v43 }
 0x152   :  { %v873_v47 = vadd.f32 %v872_v19, %v802_v39 }
 0x153   :  { %v1017_v41 = vadd.f32 %v1016_v31, %v946_v48 }
 0x154   :  { %v944_v53 = vadd.f32 %v943_v22, %v873_v47 }
 0x156   :  { %v1015_v59 = vadd.f32 %v1014_v25, %v944_v53 }
 0x187   :  { %v1085_v27 = vpop.f32.mrf.mxu0 }
 0x188   :  { %v1086_v62 = vadd.f32 %v1085_v27, %v1015_v59 }
 0x189   :  { %v1156_v34 = vpop.f32.mrf.mxu1  ;;  %v1087_v35 = vpop.f32.mrf.mxu0 }
 0x18a   :  { %v1157_v44 = vadd.f32 %v1156_v34, %v671_v37  ;;  %v1088_v60 = vadd.f32 %v1087_v35, %v1017_v41 }
 0x18b   :  { %v1158_v42 = vpop.f32.mrf.mxu1 }
 0x18c   :  { %v1159_v49 = vadd.f32 %v1158_v42, %v675_v40  ;;  %v1449_v2 = vcombine.low %v1086_v62, %v1088_v60 }
 0x18e   :  { %v1457_v7 = vrot.slane %v1449_v2, %v1868_v52 }
 0x1c9   :  { %v1227_v38 = vpop.f32.mrf.mxu0 }
 0x1ca   :  { %v1228_v51 = vadd.f32 %v1227_v38, %v1157_v44 }
 0x1cb   :  { %v1298_v45 = vpop.f32.mrf.mxu1  ;;  %v1229_v46 = vpop.f32.mrf.mxu0 }
 0x1cc   :  { %v1230_v54 = vadd.f32 %v1229_v46, %v1159_v49  ;;  %v1299_v56 = vadd.f32 %v1298_v45, %v1228_v51 }
 0x1cd   :  { %v1300_v55 = vpop.f32.mrf.mxu1 }
 0x1ce   :  { %v1301_v8 = vadd.f32 %v1300_v55, %v1230_v54 }
 0x20c   :  { %v1369_v57 = vpop.f32.mrf.mxu0  ;;  %v1440_v58 = vpop.f32.mrf.mxu1 }
 0x20d   :  { %v1370_v61 = vadd.f32 %v1369_v57, %v1299_v56 }
 0x20e   :  { %v1371_v63 = vpop.f32.mrf.mxu0  ;;  %v1442_v1 = vpop.f32.mrf.mxu1 }
 0x20f   :  { %v1372_v0 = vadd.f32 %v1371_v63, %v1301_v8  ;;  %v1441_v4 = vadd.f32 %v1440_v58, %v1370_v61 }
 0x211   :  { %v1443_v5 = vadd.f32 %v1442_v1, %v1372_v0 }
 0x213   :  { %v1450_v6 = vcombine.low %v1441_v4, %v1443_v5 }
 0x215   :  { %v1464_v9 = vrot.slane %v1450_v6, %v1868_v52 }
 0x217   :  { %v1465_v10 = vcombine.low %v1457_v7, %v1464_v9 }
 0x219   :  { %1467 = vst [vmem:[#allocation2] sm:$0xff] %v1465_v10 }
 0x21a   :  { %1499 = shalt.err (!%p1496_p4)
}
 0x21b   :  { %1477 = dma.vmem_to_hbm [thread:$0]  %s1475_s2, 128, %s3532_s3, [#allocation3]  }
 0x21c   :  { %1508 = dma.done.wait [#allocation3], 128  }
 0x21d   :  { %1509 = vsyncadd [#allocation3], 4294967168 }
 0x21e   :  { %1481 = vsyncpa [#allocation3], 1 }

</bundles_post_ra>
